<compile_context>
chip_gen: v7x
topology: tpu7x:2x2x1
jax: 0.10.0
libtpu: 0.0.40
codegen_flags: <defaults>
</compile_context>

<pallas_src>
import numpy as np
import jax
import jax.numpy as jnp
from jax import lax
from jax.experimental import pallas as pl
from jax.experimental.pallas import tpu as pltpu

# Problem sizes implied by the module: 720 = 20 * 6 * 6  ->  input spatial 12x12
H = W = 12
CIN = 3
COUT = 20
HP, WP = H + 2, W + 2            # padded spatial (14, 14)
HID = 64
OUT = 3
HPOOL, WPOOL = H // 2, W // 2    # 6, 6
KWIN = 4 * WP * CIN              # 168: 4 padded rows per pooled-row window
PARITY_STRIDE = 256              # lane-aligned per-parity conv block (240 used)
CONV_N = 2 * PARITY_STRIDE       # 512
POOL_N = 128                     # lane-dense pooled width (120 used)
OUT_N = 128                      # lane-dense final output width (3 used)


def _round_up(x, m):
    return (x + m - 1) // m * m


def cnn_kernel(xcol_ref, mconv_ref, bconv_ref, ccol_ref,
               w1_ref, b1_ref, w2_ref, b2_ref, o_ref):
    tb = o_ref.shape[0]                       # batch tile (static)

    # Hoist weight/bias loads once per grid step (no re-indexing inside the
    # unrolled pooled-row loop).
    mconv = mconv_ref[...]                    # (168, 512) bf16
    bconv = bconv_ref[...]                    # (1, 512)   f32
    ccol0 = ccol_ref[0]                       # (256, 128) f32
    ccol1 = ccol_ref[1]                       # (256, 128) f32
    b1 = b1_ref[...]                          # (1, 64)    f32

    h1 = jnp.zeros((tb, HID), jnp.float32)
    for hp in range(HPOOL):                   # 6 pooled rows, static unroll
        xw = xcol_ref[hp]                     # (TB, 168) bf16: all images, window hp
        # conv(3x3, pad=1) for output rows 2hp and 2hp+1 as ONE matmul.
        # Output lanes: parity*256 + w*COUT + co  (lanes 240..255 of each
        # parity block are zero padding).
        fm = jnp.dot(xw, mconv, preferred_element_type=jnp.float32)   # (TB, 512)
        fm = jnp.maximum(fm + bconv, 0.0)                              # bias + ReLU
        # 2x2 max-pool: rows = max of the two lane-aligned parity halves,
        # columns = 0/1 selection matmuls (valid: post-ReLU values >= 0).
        rp = jnp.maximum(fm[:, :PARITY_STRIDE], fm[:, PARITY_STRIDE:])  # (TB, 256)
        pooled = jnp.maximum(
            jnp.dot(rp, ccol0, preferred_element_type=jnp.float32),
            jnp.dot(rp, ccol1, preferred_element_type=jnp.float32))     # (TB, 128)
        # Linear(720, 64): partial contraction for this pooled row.
        h1 = h1 + jnp.dot(pooled.astype(jnp.bfloat16), w1_ref[hp],
                          preferred_element_type=jnp.float32)           # (TB, 64)

    h1 = jnp.maximum(h1 + b1, 0.0)
    # Linear(64, 3), zero-padded to a lane-dense 128-wide output.
    o_ref[...] = jnp.dot(h1, w2_ref[...],
                         preferred_element_type=jnp.float32) + b2_ref[...]


def init_params(key):
    """Deterministic PyTorch-style (uniform +-1/sqrt(fan_in)) parameter init."""
    ks = jax.random.split(key, 6)
    bc1 = 1.0 / np.sqrt(CIN * 3 * 3)
    bl1 = 1.0 / np.sqrt(720)
    bl2 = 1.0 / np.sqrt(HID)
    wc = jax.random.uniform(ks[0], (COUT, CIN, 3, 3), jnp.float32, -bc1, bc1)
    bc = jax.random.uniform(ks[1], (COUT,), jnp.float32, -bc1, bc1)
    w1 = jax.random.uniform(ks[2], (HID, 720), jnp.float32, -bl1, bl1)
    b1 = jax.random.uniform(ks[3], (HID,), jnp.float32, -bl1, bl1)
    w2 = jax.random.uniform(ks[4], (OUT, HID), jnp.float32, -bl2, bl2)
    b2 = jax.random.uniform(ks[5], (OUT,), jnp.float32, -bl2, bl2)
    return wc, bc, w1, b1, w2, b2


def prepare_kernel_params(wc, bc, w1, b1, w2, b2):
    """Plain-numpy glue: reshape parameters into the kernel's layouts."""
    wc_np = np.asarray(wc, np.float32)

    # Conv matrix for one pooled-row window (4 padded rows -> 2 output rows):
    #   row    = r*42 + w_in*3 + c   (r = relative padded row in the 4-row window)
    #   column = p*256 + w*20 + co   (p = output-row parity within the window)
    M = np.zeros((KWIN, CONV_N), np.float32)
    for p in range(2):
        for dy in range(3):
            r = p + dy
            for w_out in range(W):
                for kx in range(3):
                    w_in = w_out + kx
                    for c in range(CIN):
                        col0 = p * PARITY_STRIDE + w_out * COUT
                        M[r * (WP * CIN) + w_in * CIN + c,
                          col0:col0 + COUT] = wc_np[:, c, dy, kx]

    # Conv bias broadcast over width/parity (zero in the padded lanes).
    bct = np.zeros((1, CONV_N), np.float32)
    bc_np = np.asarray(bc, np.float32)
    for p in range(2):
        for w_out in range(W):
            col0 = p * PARITY_STRIDE + w_out * COUT
            bct[0, col0:col0 + COUT] = bc_np

    # Column-pool 0/1 selection matrices (even / odd width), lane-dense 128 out.
    Ccol = np.zeros((2, PARITY_STRIDE, POOL_N), np.float32)
    for wp in range(WPOOL):
        for c in range(COUT):
            Ccol[0, (2 * wp) * COUT + c, wp * COUT + c] = 1.0
            Ccol[1, (2 * wp + 1) * COUT + c, wp * COUT + c] = 1.0

    # Linear(720,64): torch flatten order is (c, h, w); kernel order is (h, w*COUT+c).
    w1r = np.asarray(w1, np.float32).reshape(HID, COUT, HPOOL, WPOOL)   # (j,c,h,w)
    w1blk = np.transpose(w1r, (2, 3, 1, 0)).reshape(HPOOL, WPOOL * COUT, HID)
    w1pad = np.zeros((HPOOL, POOL_N, HID), np.float32)
    w1pad[:, :WPOOL * COUT, :] = w1blk
    b1t = np.asarray(b1, np.float32).reshape(1, HID)

    # Linear(64,3) zero-padded to a lane-dense 128-wide output.
    w2pad = np.zeros((HID, OUT_N), np.float32)
    w2pad[:, :OUT] = np.asarray(w2, np.float32).T
    b2pad = np.zeros((1, OUT_N), np.float32)
    b2pad[0, :OUT] = np.asarray(b2, np.float32)

    return (jnp.asarray(M, jnp.bfloat16), jnp.asarray(bct), jnp.asarray(Ccol),
            jnp.asarray(w1pad, jnp.bfloat16), jnp.asarray(b1t),
            jnp.asarray(w2pad), jnp.asarray(b2pad))


def cnnet_forward(x, params, *, block_b=256):
    """x: (B, CIN, 12, 12) NCHW float32 (matches the PyTorch module)."""
    M, bct, Ccol, w1pad, b1t, w2pad, b2pad = params
    B = x.shape[0]
    tb = min(block_b, _round_up(B, 8))        # batch tile (multiple of 8)
    bpad = _round_up(B, tb)
    n_blocks = bpad // tb

    # Glue: NCHW -> padded NHWC -> collapse (W, C) -> per-pooled-row 4-row windows.
    xp = jnp.transpose(x, (0, 2, 3, 1))                             # (B,12,12,3)
    xp = jnp.pad(xp, ((0, 0), (1, 1), (1, 1), (0, 0)))              # (B,14,14,3)
    xr = xp.reshape(B, HP, WP * CIN).astype(jnp.float32)            # (B,14,42)
    rows = 2 * jnp.arange(HPOOL)[:, None] + jnp.arange(4)[None, :]  # (6,4)
    xcol = xr[:, rows, :].reshape(B, HPOOL, KWIN)                   # (B,6,168)
    xcol = jnp.transpose(xcol, (1, 0, 2))                           # (6,B,168)
    xcol = jnp.pad(xcol, ((0, 0), (0, bpad - B), (0, 0))).astype(jnp.bfloat16)

    out = pl.pallas_call(
        cnn_kernel,
        out_shape=jax.ShapeDtypeStruct((bpad, OUT_N), jnp.float32),
        grid=(n_blocks,),
        in_specs=[
            pl.BlockSpec((HPOOL, tb, KWIN), lambda i: (0, i, 0)),          # xcol
            pl.BlockSpec((KWIN, CONV_N), lambda i: (0, 0)),                # M
            pl.BlockSpec((1, CONV_N), lambda i: (0, 0)),                   # conv bias
            pl.BlockSpec((2, PARITY_STRIDE, POOL_N), lambda i: (0, 0, 0)),  # Ccol
            pl.BlockSpec((HPOOL, POOL_N, HID), lambda i: (0, 0, 0)),       # w1
            pl.BlockSpec((1, HID), lambda i: (0, 0)),                      # b1
            pl.BlockSpec((HID, OUT_N), lambda i: (0, 0)),                  # w2
            pl.BlockSpec((1, OUT_N), lambda i: (0, 0)),                    # b2
        ],
        out_specs=pl.BlockSpec((tb, OUT_N), lambda i: (i, 0)),
        compiler_params=pltpu.CompilerParams(
            dimension_semantics=("parallel",)),   # batch axis: shard across TCs (v7x)
    )(xcol, M, bct, Ccol, w1pad, b1t, w2pad, b2pad)
    return out[:B, :OUT]


def reference_forward(x, wc, bc, w1, b1, w2, b2):
    """Pure-JAX replica of the PyTorch forward (NCHW), for validation."""
    y = lax.conv_general_dilated(x, wc, window_strides=(1, 1),
                                 padding=((1, 1), (1, 1)),
                                 dimension_numbers=("NCHW", "OIHW", "NCHW"))
    y = jnp.maximum(y + bc[None, :, None, None], 0.0)
    y = lax.reduce_window(y, -jnp.inf, lax.max, (1, 1, 2, 2), (1, 1, 2, 2), "VALID")
    y = y.reshape(x.shape[0], -1)                 # C-major flatten == torch .view
    y = jnp.maximum(y @ w1.T + b1, 0.0)
    return y @ w2.T + b2


if __name__ == "__main__":
    key = jax.random.PRNGKey(0)
    kx, kx2, kp = jax.random.split(key, 3)

    wc, bc, w1, b1, w2, b2 = init_params(kp)
    params = prepare_kernel_params(wc, bc, w1, b1, w2, b2)

    # Small demo batch (single grid step).
    B = 2
    x = jax.random.normal(kx, (B, CIN, H, W), jnp.float32)
    out = jax.block_until_ready(cnnet_forward(x, params))
    ref = reference_forward(x, wc, bc, w1, b1, w2, b2)
    # bf16 MXU inputs with f32 accumulation -> slightly relaxed tolerance.
    np.testing.assert_allclose(np.asarray(out), np.asarray(ref), rtol=2e-2, atol=2e-2)

    # Multi-block path: grid > 1 and batch not a multiple of the batch tile.
    B2 = 20
    x2 = jax.random.normal(kx2, (B2, CIN, H, W), jnp.float32)
    out2 = jax.block_until_ready(cnnet_forward(x2, params, block_b=8))
    ref2 = reference_forward(x2, wc, bc, w1, b1, w2, b2)
    np.testing.assert_allclose(np.asarray(out2), np.asarray(ref2), rtol=2e-2, atol=2e-2)

    print("KERNEL_OK")
</pallas_src>

<mosaic_0001>
module attributes {stable_mosaic.version = 11 : i64} {
  func.func @cnn_kernel(%arg0: i32, %arg1: memref<6x8x168xbf16, #tpu.memory_space<vmem>>, %arg2: memref<168x512xbf16, #tpu.memory_space<vmem>>, %arg3: memref<1x512xf32, #tpu.memory_space<vmem>>, %arg4: memref<2x256x128xf32, #tpu.memory_space<vmem>>, %arg5: memref<6x128x64xbf16, #tpu.memory_space<vmem>>, %arg6: memref<1x64xf32, #tpu.memory_space<vmem>>, %arg7: memref<64x128xf32, #tpu.memory_space<vmem>>, %arg8: memref<1x128xf32, #tpu.memory_space<vmem>>, %arg9: memref<8x128xf32, #tpu.memory_space<vmem>>) attributes {dimension_semantics = [#tpu.dimension_semantics<parallel>], iteration_bounds = array<i64: 1>, scalar_prefetch = 0 : i64, scratch_operands = 0 : i64, tpu.core_type = #tpu.core_type<tc>, window_params = [{transform_indices = @transform_0, window_bounds = array<i64: 6, 8, 168>}, {pipeline_mode = #tpu.pipeline_mode<synchronous>, transform_indices = @transform_1, window_bounds = array<i64: 168, 512>}, {pipeline_mode = #tpu.pipeline_mode<synchronous>, transform_indices = @transform_2, window_bounds = array<i64: 1, 512>}, {pipeline_mode = #tpu.pipeline_mode<synchronous>, transform_indices = @transform_3, window_bounds = array<i64: 2, 256, 128>}, {pipeline_mode = #tpu.pipeline_mode<synchronous>, transform_indices = @transform_4, window_bounds = array<i64: 6, 128, 64>}, {pipeline_mode = #tpu.pipeline_mode<synchronous>, transform_indices = @transform_5, window_bounds = array<i64: 1, 64>}, {pipeline_mode = #tpu.pipeline_mode<synchronous>, transform_indices = @transform_6, window_bounds = array<i64: 64, 128>}, {pipeline_mode = #tpu.pipeline_mode<synchronous>, transform_indices = @transform_7, window_bounds = array<i64: 1, 128>}, {transform_indices = @transform_8, window_bounds = array<i64: 8, 128>}]} {
    %c0 = arith.constant 0 : index
    %c0_0 = arith.constant 0 : index
    %0 = vector.load %arg2[%c0, %c0_0] : memref<168x512xbf16, #tpu.memory_space<vmem>>, vector<168x512xbf16>
    %c0_1 = arith.constant 0 : index
    %c0_2 = arith.constant 0 : index
    %1 = vector.load %arg3[%c0_1, %c0_2] : memref<1x512xf32, #tpu.memory_space<vmem>>, vector<1x512xf32>
    %c0_3 = arith.constant 0 : index
    %c0_4 = arith.constant 0 : index
    %c0_5 = arith.constant 0 : index
    %2 = vector.load %arg4[%c0_3, %c0_4, %c0_5] : memref<2x256x128xf32, #tpu.memory_space<vmem>>, vector<1x256x128xf32>
    %3 = vector.shape_cast %2 : vector<1x256x128xf32> to vector<256x128xf32>
    %c1 = arith.constant 1 : index
    %c0_6 = arith.constant 0 : index
    %c0_7 = arith.constant 0 : index
    %4 = vector.load %arg4[%c1, %c0_6, %c0_7] : memref<2x256x128xf32, #tpu.memory_space<vmem>>, vector<1x256x128xf32>
    %5 = vector.shape_cast %4 : vector<1x256x128xf32> to vector<256x128xf32>
    %c0_8 = arith.constant 0 : index
    %c0_9 = arith.constant 0 : index
    %6 = vector.load %arg6[%c0_8, %c0_9] : memref<1x64xf32, #tpu.memory_space<vmem>>, vector<1x64xf32>
    %cst = arith.constant 0.000000e+00 : f32
    %7 = vector.broadcast %cst : f32 to vector<8x64xf32>
    %c0_10 = arith.constant 0 : index
    %c0_11 = arith.constant 0 : index
    %c0_12 = arith.constant 0 : index
    %8 = vector.load %arg1[%c0_10, %c0_11, %c0_12] : memref<6x8x168xbf16, #tpu.memory_space<vmem>>, vector<1x8x168xbf16>
    %9 = vector.shape_cast %8 : vector<1x8x168xbf16> to vector<8x168xbf16>
    %cst_13 = arith.constant dense<0.000000e+00> : vector<8x512xf32>
    %10 = tpu.matmul %9, %0, %cst_13 {dimension_numbers = #tpu.dot_dimension_numbers<[1], [0], [0], [1], [0, 0, 1, 1], [], []>} : vector<8x168xbf16>, vector<168x512xbf16>, vector<8x512xf32> -> vector<8x512xf32>
    %11 = vector.broadcast %1 : vector<1x512xf32> to vector<8x512xf32>
    %12 = arith.addf %10, %11 : vector<8x512xf32>
    %cst_14 = arith.constant 0.000000e+00 : f32
    %13 = vector.broadcast %cst_14 : f32 to vector<8x512xf32>
    %14 = arith.maximumf %12, %13 : vector<8x512xf32>
    %15 = vector.extract_strided_slice %14 {offsets = [0, 0], sizes = [8, 256], strides = [1, 1]} : vector<8x512xf32> to vector<8x256xf32>
    %16 = vector.extract_strided_slice %14 {offsets = [0, 256], sizes = [8, 256], strides = [1, 1]} : vector<8x512xf32> to vector<8x256xf32>
    %17 = arith.maximumf %15, %16 : vector<8x256xf32>
    %cst_15 = arith.constant dense<0.000000e+00> : vector<8x128xf32>
    %18 = tpu.matmul %17, %3, %cst_15 {dimension_numbers = #tpu.dot_dimension_numbers<[1], [0], [0], [1], [0, 0, 1, 1], [], []>} : vector<8x256xf32>, vector<256x128xf32>, vector<8x128xf32> -> vector<8x128xf32>
    %cst_16 = arith.constant dense<0.000000e+00> : vector<8x128xf32>
    %19 = tpu.matmul %17, %5, %cst_16 {dimension_numbers = #tpu.dot_dimension_numbers<[1], [0], [0], [1], [0, 0, 1, 1], [], []>} : vector<8x256xf32>, vector<256x128xf32>, vector<8x128xf32> -> vector<8x128xf32>
    %20 = arith.maximumf %18, %19 : vector<8x128xf32>
    %21 = arith.truncf %20 : vector<8x128xf32> to vector<8x128xbf16>
    %c0_17 = arith.constant 0 : index
    %c0_18 = arith.constant 0 : index
    %c0_19 = arith.constant 0 : index
    %22 = vector.load %arg5[%c0_17, %c0_18, %c0_19] : memref<6x128x64xbf16, #tpu.memory_space<vmem>>, vector<1x128x64xbf16>
    %23 = vector.shape_cast %22 : vector<1x128x64xbf16> to vector<128x64xbf16>
    %cst_20 = arith.constant dense<0.000000e+00> : vector<8x64xf32>
    %24 = tpu.matmul %21, %23, %cst_20 {dimension_numbers = #tpu.dot_dimension_numbers<[1], [0], [0], [1], [0, 0, 1, 1], [], []>} : vector<8x128xbf16>, vector<128x64xbf16>, vector<8x64xf32> -> vector<8x64xf32>
    %25 = arith.addf %7, %24 : vector<8x64xf32>
    %c1_21 = arith.constant 1 : index
    %c0_22 = arith.constant 0 : index
    %c0_23 = arith.constant 0 : index
    %26 = vector.load %arg1[%c1_21, %c0_22, %c0_23] : memref<6x8x168xbf16, #tpu.memory_space<vmem>>, vector<1x8x168xbf16>
    %27 = vector.shape_cast %26 : vector<1x8x168xbf16> to vector<8x168xbf16>
    %cst_24 = arith.constant dense<0.000000e+00> : vector<8x512xf32>
    %28 = tpu.matmul %27, %0, %cst_24 {dimension_numbers = #tpu.dot_dimension_numbers<[1], [0], [0], [1], [0, 0, 1, 1], [], []>} : vector<8x168xbf16>, vector<168x512xbf16>, vector<8x512xf32> -> vector<8x512xf32>
    %29 = vector.broadcast %1 : vector<1x512xf32> to vector<8x512xf32>
    %30 = arith.addf %28, %29 : vector<8x512xf32>
    %cst_25 = arith.constant 0.000000e+00 : f32
    %31 = vector.broadcast %cst_25 : f32 to vector<8x512xf32>
    %32 = arith.maximumf %30, %31 : vector<8x512xf32>
    %33 = vector.extract_strided_slice %32 {offsets = [0, 0], sizes = [8, 256], strides = [1, 1]} : vector<8x512xf32> to vector<8x256xf32>
    %34 = vector.extract_strided_slice %32 {offsets = [0, 256], sizes = [8, 256], strides = [1, 1]} : vector<8x512xf32> to vector<8x256xf32>
    %35 = arith.maximumf %33, %34 : vector<8x256xf32>
    %cst_26 = arith.constant dense<0.000000e+00> : vector<8x128xf32>
    %36 = tpu.matmul %35, %3, %cst_26 {dimension_numbers = #tpu.dot_dimension_numbers<[1], [0], [0], [1], [0, 0, 1, 1], [], []>} : vector<8x256xf32>, vector<256x128xf32>, vector<8x128xf32> -> vector<8x128xf32>
    %cst_27 = arith.constant dense<0.000000e+00> : vector<8x128xf32>
    %37 = tpu.matmul %35, %5, %cst_27 {dimension_numbers = #tpu.dot_dimension_numbers<[1], [0], [0], [1], [0, 0, 1, 1], [], []>} : vector<8x256xf32>, vector<256x128xf32>, vector<8x128xf32> -> vector<8x128xf32>
    %38 = arith.maximumf %36, %37 : vector<8x128xf32>
    %39 = arith.truncf %38 : vector<8x128xf32> to vector<8x128xbf16>
    %c1_28 = arith.constant 1 : index
    %c0_29 = arith.constant 0 : index
    %c0_30 = arith.constant 0 : index
    %40 = vector.load %arg5[%c1_28, %c0_29, %c0_30] : memref<6x128x64xbf16, #tpu.memory_space<vmem>>, vector<1x128x64xbf16>
    %41 = vector.shape_cast %40 : vector<1x128x64xbf16> to vector<128x64xbf16>
    %cst_31 = arith.constant dense<0.000000e+00> : vector<8x64xf32>
    %42 = tpu.matmul %39, %41, %cst_31 {dimension_numbers = #tpu.dot_dimension_numbers<[1], [0], [0], [1], [0, 0, 1, 1], [], []>} : vector<8x128xbf16>, vector<128x64xbf16>, vector<8x64xf32> -> vector<8x64xf32>
    %43 = arith.addf %25, %42 : vector<8x64xf32>
    %c2 = arith.constant 2 : index
    %c0_32 = arith.constant 0 : index
    %c0_33 = arith.constant 0 : index
    %44 = vector.load %arg1[%c2, %c0_32, %c0_33] : memref<6x8x168xbf16, #tpu.memory_space<vmem>>, vector<1x8x168xbf16>
    %45 = vector.shape_cast %44 : vector<1x8x168xbf16> to vector<8x168xbf16>
    %cst_34 = arith.constant dense<0.000000e+00> : vector<8x512xf32>
    %46 = tpu.matmul %45, %0, %cst_34 {dimension_numbers = #tpu.dot_dimension_numbers<[1], [0], [0], [1], [0, 0, 1, 1], [], []>} : vector<8x168xbf16>, vector<168x512xbf16>, vector<8x512xf32> -> vector<8x512xf32>
    %47 = vector.broadcast %1 : vector<1x512xf32> to vector<8x512xf32>
    %48 = arith.addf %46, %47 : vector<8x512xf32>
    %cst_35 = arith.constant 0.000000e+00 : f32
    %49 = vector.broadcast %cst_35 : f32 to vector<8x512xf32>
    %50 = arith.maximumf %48, %49 : vector<8x512xf32>
    %51 = vector.extract_strided_slice %50 {offsets = [0, 0], sizes = [8, 256], strides = [1, 1]} : vector<8x512xf32> to vector<8x256xf32>
    %52 = vector.extract_strided_slice %50 {offsets = [0, 256], sizes = [8, 256], strides = [1, 1]} : vector<8x512xf32> to vector<8x256xf32>
    %53 = arith.maximumf %51, %52 : vector<8x256xf32>
    %cst_36 = arith.constant dense<0.000000e+00> : vector<8x128xf32>
    %54 = tpu.matmul %53, %3, %cst_36 {dimension_numbers = #tpu.dot_dimension_numbers<[1], [0], [0], [1], [0, 0, 1, 1], [], []>} : vector<8x256xf32>, vector<256x128xf32>, vector<8x128xf32> -> vector<8x128xf32>
    %cst_37 = arith.constant dense<0.000000e+00> : vector<8x128xf32>
    %55 = tpu.matmul %53, %5, %cst_37 {dimension_numbers = #tpu.dot_dimension_numbers<[1], [0], [0], [1], [0, 0, 1, 1], [], []>} : vector<8x256xf32>, vector<256x128xf32>, vector<8x128xf32> -> vector<8x128xf32>
    %56 = arith.maximumf %54, %55 : vector<8x128xf32>
    %57 = arith.truncf %56 : vector<8x128xf32> to vector<8x128xbf16>
    %c2_38 = arith.constant 2 : index
    %c0_39 = arith.constant 0 : index
    %c0_40 = arith.constant 0 : index
    %58 = vector.load %arg5[%c2_38, %c0_39, %c0_40] : memref<6x128x64xbf16, #tpu.memory_space<vmem>>, vector<1x128x64xbf16>
    %59 = vector.shape_cast %58 : vector<1x128x64xbf16> to vector<128x64xbf16>
    %cst_41 = arith.constant dense<0.000000e+00> : vector<8x64xf32>
    %60 = tpu.matmul %57, %59, %cst_41 {dimension_numbers = #tpu.dot_dimension_numbers<[1], [0], [0], [1], [0, 0, 1, 1], [], []>} : vector<8x128xbf16>, vector<128x64xbf16>, vector<8x64xf32> -> vector<8x64xf32>
    %61 = arith.addf %43, %60 : vector<8x64xf32>
    %c3 = arith.constant 3 : index
    %c0_42 = arith.constant 0 : index
    %c0_43 = arith.constant 0 : index
    %62 = vector.load %arg1[%c3, %c0_42, %c0_43] : memref<6x8x168xbf16, #tpu.memory_space<vmem>>, vector<1x8x168xbf16>
    %63 = vector.shape_cast %62 : vector<1x8x168xbf16> to vector<8x168xbf16>
    %cst_44 = arith.constant dense<0.000000e+00> : vector<8x512xf32>
    %64 = tpu.matmul %63, %0, %cst_44 {dimension_numbers = #tpu.dot_dimension_numbers<[1], [0], [0], [1], [0, 0, 1, 1], [], []>} : vector<8x168xbf16>, vector<168x512xbf16>, vector<8x512xf32> -> vector<8x512xf32>
    %65 = vector.broadcast %1 : vector<1x512xf32> to vector<8x512xf32>
    %66 = arith.addf %64, %65 : vector<8x512xf32>
    %cst_45 = arith.constant 0.000000e+00 : f32
    %67 = vector.broadcast %cst_45 : f32 to vector<8x512xf32>
    %68 = arith.maximumf %66, %67 : vector<8x512xf32>
    %69 = vector.extract_strided_slice %68 {offsets = [0, 0], sizes = [8, 256], strides = [1, 1]} : vector<8x512xf32> to vector<8x256xf32>
    %70 = vector.extract_strided_slice %68 {offsets = [0, 256], sizes = [8, 256], strides = [1, 1]} : vector<8x512xf32> to vector<8x256xf32>
    %71 = arith.maximumf %69, %70 : vector<8x256xf32>
    %cst_46 = arith.constant dense<0.000000e+00> : vector<8x128xf32>
    %72 = tpu.matmul %71, %3, %cst_46 {dimension_numbers = #tpu.dot_dimension_numbers<[1], [0], [0], [1], [0, 0, 1, 1], [], []>} : vector<8x256xf32>, vector<256x128xf32>, vector<8x128xf32> -> vector<8x128xf32>
    %cst_47 = arith.constant dense<0.000000e+00> : vector<8x128xf32>
    %73 = tpu.matmul %71, %5, %cst_47 {dimension_numbers = #tpu.dot_dimension_numbers<[1], [0], [0], [1], [0, 0, 1, 1], [], []>} : vector<8x256xf32>, vector<256x128xf32>, vector<8x128xf32> -> vector<8x128xf32>
    %74 = arith.maximumf %72, %73 : vector<8x128xf32>
    %75 = arith.truncf %74 : vector<8x128xf32> to vector<8x128xbf16>
    %c3_48 = arith.constant 3 : index
    %c0_49 = arith.constant 0 : index
    %c0_50 = arith.constant 0 : index
    %76 = vector.load %arg5[%c3_48, %c0_49, %c0_50] : memref<6x128x64xbf16, #tpu.memory_space<vmem>>, vector<1x128x64xbf16>
    %77 = vector.shape_cast %76 : vector<1x128x64xbf16> to vector<128x64xbf16>
    %cst_51 = arith.constant dense<0.000000e+00> : vector<8x64xf32>
    %78 = tpu.matmul %75, %77, %cst_51 {dimension_numbers = #tpu.dot_dimension_numbers<[1], [0], [0], [1], [0, 0, 1, 1], [], []>} : vector<8x128xbf16>, vector<128x64xbf16>, vector<8x64xf32> -> vector<8x64xf32>
    %79 = arith.addf %61, %78 : vector<8x64xf32>
    %c4 = arith.constant 4 : index
    %c0_52 = arith.constant 0 : index
    %c0_53 = arith.constant 0 : index
    %80 = vector.load %arg1[%c4, %c0_52, %c0_53] : memref<6x8x168xbf16, #tpu.memory_space<vmem>>, vector<1x8x168xbf16>
    %81 = vector.shape_cast %80 : vector<1x8x168xbf16> to vector<8x168xbf16>
    %cst_54 = arith.constant dense<0.000000e+00> : vector<8x512xf32>
    %82 = tpu.matmul %81, %0, %cst_54 {dimension_numbers = #tpu.dot_dimension_numbers<[1], [0], [0], [1], [0, 0, 1, 1], [], []>} : vector<8x168xbf16>, vector<168x512xbf16>, vector<8x512xf32> -> vector<8x512xf32>
    %83 = vector.broadcast %1 : vector<1x512xf32> to vector<8x512xf32>
    %84 = arith.addf %82, %83 : vector<8x512xf32>
    %cst_55 = arith.constant 0.000000e+00 : f32
    %85 = vector.broadcast %cst_55 : f32 to vector<8x512xf32>
    %86 = arith.maximumf %84, %85 : vector<8x512xf32>
    %87 = vector.extract_strided_slice %86 {offsets = [0, 0], sizes = [8, 256], strides = [1, 1]} : vector<8x512xf32> to vector<8x256xf32>
    %88 = vector.extract_strided_slice %86 {offsets = [0, 256], sizes = [8, 256], strides = [1, 1]} : vector<8x512xf32> to vector<8x256xf32>
    %89 = arith.maximumf %87, %88 : vector<8x256xf32>
    %cst_56 = arith.constant dense<0.000000e+00> : vector<8x128xf32>
    %90 = tpu.matmul %89, %3, %cst_56 {dimension_numbers = #tpu.dot_dimension_numbers<[1], [0], [0], [1], [0, 0, 1, 1], [], []>} : vector<8x256xf32>, vector<256x128xf32>, vector<8x128xf32> -> vector<8x128xf32>
    %cst_57 = arith.constant dense<0.000000e+00> : vector<8x128xf32>
    %91 = tpu.matmul %89, %5, %cst_57 {dimension_numbers = #tpu.dot_dimension_numbers<[1], [0], [0], [1], [0, 0, 1, 1], [], []>} : vector<8x256xf32>, vector<256x128xf32>, vector<8x128xf32> -> vector<8x128xf32>
    %92 = arith.maximumf %90, %91 : vector<8x128xf32>
    %93 = arith.truncf %92 : vector<8x128xf32> to vector<8x128xbf16>
    %c4_58 = arith.constant 4 : index
    %c0_59 = arith.constant 0 : index
    %c0_60 = arith.constant 0 : index
    %94 = vector.load %arg5[%c4_58, %c0_59, %c0_60] : memref<6x128x64xbf16, #tpu.memory_space<vmem>>, vector<1x128x64xbf16>
    %95 = vector.shape_cast %94 : vector<1x128x64xbf16> to vector<128x64xbf16>
    %cst_61 = arith.constant dense<0.000000e+00> : vector<8x64xf32>
    %96 = tpu.matmul %93, %95, %cst_61 {dimension_numbers = #tpu.dot_dimension_numbers<[1], [0], [0], [1], [0, 0, 1, 1], [], []>} : vector<8x128xbf16>, vector<128x64xbf16>, vector<8x64xf32> -> vector<8x64xf32>
    %97 = arith.addf %79, %96 : vector<8x64xf32>
    %c5 = arith.constant 5 : index
    %c0_62 = arith.constant 0 : index
    %c0_63 = arith.constant 0 : index
    %98 = vector.load %arg1[%c5, %c0_62, %c0_63] : memref<6x8x168xbf16, #tpu.memory_space<vmem>>, vector<1x8x168xbf16>
    %99 = vector.shape_cast %98 : vector<1x8x168xbf16> to vector<8x168xbf16>
    %cst_64 = arith.constant dense<0.000000e+00> : vector<8x512xf32>
    %100 = tpu.matmul %99, %0, %cst_64 {dimension_numbers = #tpu.dot_dimension_numbers<[1], [0], [0], [1], [0, 0, 1, 1], [], []>} : vector<8x168xbf16>, vector<168x512xbf16>, vector<8x512xf32> -> vector<8x512xf32>
    %101 = vector.broadcast %1 : vector<1x512xf32> to vector<8x512xf32>
    %102 = arith.addf %100, %101 : vector<8x512xf32>
    %cst_65 = arith.constant 0.000000e+00 : f32
    %103 = vector.broadcast %cst_65 : f32 to vector<8x512xf32>
    %104 = arith.maximumf %102, %103 : vector<8x512xf32>
    %105 = vector.extract_strided_slice %104 {offsets = [0, 0], sizes = [8, 256], strides = [1, 1]} : vector<8x512xf32> to vector<8x256xf32>
    %106 = vector.extract_strided_slice %104 {offsets = [0, 256], sizes = [8, 256], strides = [1, 1]} : vector<8x512xf32> to vector<8x256xf32>
    %107 = arith.maximumf %105, %106 : vector<8x256xf32>
    %cst_66 = arith.constant dense<0.000000e+00> : vector<8x128xf32>
    %108 = tpu.matmul %107, %3, %cst_66 {dimension_numbers = #tpu.dot_dimension_numbers<[1], [0], [0], [1], [0, 0, 1, 1], [], []>} : vector<8x256xf32>, vector<256x128xf32>, vector<8x128xf32> -> vector<8x128xf32>
    %cst_67 = arith.constant dense<0.000000e+00> : vector<8x128xf32>
    %109 = tpu.matmul %107, %5, %cst_67 {dimension_numbers = #tpu.dot_dimension_numbers<[1], [0], [0], [1], [0, 0, 1, 1], [], []>} : vector<8x256xf32>, vector<256x128xf32>, vector<8x128xf32> -> vector<8x128xf32>
    %110 = arith.maximumf %108, %109 : vector<8x128xf32>
    %111 = arith.truncf %110 : vector<8x128xf32> to vector<8x128xbf16>
    %c5_68 = arith.constant 5 : index
    %c0_69 = arith.constant 0 : index
    %c0_70 = arith.constant 0 : index
    %112 = vector.load %arg5[%c5_68, %c0_69, %c0_70] : memref<6x128x64xbf16, #tpu.memory_space<vmem>>, vector<1x128x64xbf16>
    %113 = vector.shape_cast %112 : vector<1x128x64xbf16> to vector<128x64xbf16>
    %cst_71 = arith.constant dense<0.000000e+00> : vector<8x64xf32>
    %114 = tpu.matmul %111, %113, %cst_71 {dimension_numbers = #tpu.dot_dimension_numbers<[1], [0], [0], [1], [0, 0, 1, 1], [], []>} : vector<8x128xbf16>, vector<128x64xbf16>, vector<8x64xf32> -> vector<8x64xf32>
    %115 = arith.addf %97, %114 : vector<8x64xf32>
    %116 = vector.broadcast %6 : vector<1x64xf32> to vector<8x64xf32>
    %117 = arith.addf %115, %116 : vector<8x64xf32>
    %cst_72 = arith.constant 0.000000e+00 : f32
    %118 = vector.broadcast %cst_72 : f32 to vector<8x64xf32>
    %119 = arith.maximumf %117, %118 : vector<8x64xf32>
    %c0_73 = arith.constant 0 : index
    %c0_74 = arith.constant 0 : index
    %120 = vector.load %arg7[%c0_73, %c0_74] : memref<64x128xf32, #tpu.memory_space<vmem>>, vector<64x128xf32>
    %cst_75 = arith.constant dense<0.000000e+00> : vector<8x128xf32>
    %121 = tpu.matmul %119, %120, %cst_75 {dimension_numbers = #tpu.dot_dimension_numbers<[1], [0], [0], [1], [0, 0, 1, 1], [], []>} : vector<8x64xf32>, vector<64x128xf32>, vector<8x128xf32> -> vector<8x128xf32>
    %c0_76 = arith.constant 0 : index
    %c0_77 = arith.constant 0 : index
    %122 = vector.load %arg8[%c0_76, %c0_77] : memref<1x128xf32, #tpu.memory_space<vmem>>, vector<1x128xf32>
    %123 = vector.broadcast %122 : vector<1x128xf32> to vector<8x128xf32>
    %124 = arith.addf %121, %123 : vector<8x128xf32>
    %c0_78 = arith.constant 0 : index
    %c0_79 = arith.constant 0 : index
    %125 = vector.load %arg9[%c0_78, %c0_79] : memref<8x128xf32, #tpu.memory_space<vmem>>, vector<8x128xf32>
    tpu.vector_store %arg9[%c0_78, %c0_79], %124 {strides = array<i32>} : memref<8x128xf32, #tpu.memory_space<vmem>>, vector<8x128xf32>,
    return
  }
  func.func @transform_0(%arg0: i32) -> (i32, i32, i32) {
    %c0_i32 = arith.constant 0 : i32
    %c0_i32_0 = arith.constant 0 : i32
    %c0_i32_1 = arith.constant 0 : i32
    return %c0_i32, %arg0, %c0_i32_0 : i32, i32, i32
  }
  func.func @transform_1(%arg0: i32) -> (i32, i32) {
    %c0_i32 = arith.constant 0 : i32
    %c0_i32_0 = arith.constant 0 : i32
    %c0_i32_1 = arith.constant 0 : i32
    return %c0_i32, %c0_i32_0 : i32, i32
  }
  func.func @transform_2(%arg0: i32) -> (i32, i32) {
    %c0_i32 = arith.constant 0 : i32
    %c0_i32_0 = arith.constant 0 : i32
    %c0_i32_1 = arith.constant 0 : i32
    return %c0_i32, %c0_i32_0 : i32, i32
  }
  func.func @transform_3(%arg0: i32) -> (i32, i32, i32) {
    %c0_i32 = arith.constant 0 : i32
    %c0_i32_0 = arith.constant 0 : i32
    %c0_i32_1 = arith.constant 0 : i32
    %c0_i32_2 = arith.constant 0 : i32
    return %c0_i32, %c0_i32_0, %c0_i32_1 : i32, i32, i32
  }
  func.func @transform_4(%arg0: i32) -> (i32, i32, i32) {
    %c0_i32 = arith.constant 0 : i32
    %c0_i32_0 = arith.constant 0 : i32
    %c0_i32_1 = arith.constant 0 : i32
    %c0_i32_2 = arith.constant 0 : i32
    return %c0_i32, %c0_i32_0, %c0_i32_1 : i32, i32, i32
  }
  func.func @transform_5(%arg0: i32) -> (i32, i32) {
    %c0_i32 = arith.constant 0 : i32
    %c0_i32_0 = arith.constant 0 : i32
    %c0_i32_1 = arith.constant 0 : i32
    return %c0_i32, %c0_i32_0 : i32, i32
  }
  func.func @transform_6(%arg0: i32) -> (i32, i32) {
    %c0_i32 = arith.constant 0 : i32
    %c0_i32_0 = arith.constant 0 : i32
    %c0_i32_1 = arith.constant 0 : i32
    return %c0_i32, %c0_i32_0 : i32, i32
  }
  func.func @transform_7(%arg0: i32) -> (i32, i32) {
    %c0_i32 = arith.constant 0 : i32
    %c0_i32_0 = arith.constant 0 : i32
    %c0_i32_1 = arith.constant 0 : i32
    return %c0_i32, %c0_i32_0 : i32, i32
  }
  func.func @transform_8(%arg0: i32) -> (i32, i32) {
    %c0_i32 = arith.constant 0 : i32
    %c0_i32_0 = arith.constant 0 : i32
    return %arg0, %c0_i32 : i32, i32
  }
}

</mosaic_0001>

<bundles_post_ra>
// kernel: tpu_custom_call.1
= control target key start
LH: loop header
LB: loop body
LE: loop exit
PB: predicated region body
PF: predicated region fallthrough
CT: control target
= control target key end

     0   :  { %13 = vsyncpa [#allocation3], 0  ;;  %s5400_s0 = inlined_call_operand.hbm [shape: bf16[6,8,168], index: 0, kind: input, shape index: {}]   ;;  %s5401_s1 = inlined_call_operand.hbm [shape: bf16[168,512], index: 1, kind: input, shape index: {}]   ;;  %s5402_s2 = inlined_call_operand.vmem [shape: f32[1,512], index: 2, kind: input, shape index: {}]   ;;  %s5403_s3 = inlined_call_operand.vmem [shape: f32[2,256,128], index: 3, kind: input, shape index: {}]   ;;  %s5404_s4 = inlined_call_operand.vmem [shape: bf16[6,128,64], index: 4, kind: input, shape index: {}]   ;;  %s5405_s5 = inlined_call_operand.vmem [shape: f32[1,64], index: 5, kind: input, shape index: {}]   ;;  %s5406_s6 = inlined_call_operand.vmem [shape: f32[64,128], index: 6, kind: input, shape index: {}]   ;;  %s5407_s7 = inlined_call_operand.vmem [shape: f32[1,128], index: 7, kind: input, shape index: {}]   ;;  %s5408_s8 = inlined_call_operand.hbm [shape: f32[8,128], index: 8, kind: output, shape index: {}]  }
   0x1   :  { %14 = vsyncpa [#allocation6], 0 }
   0x2   :  { %15 = vsyncpa [#allocation4], 0  ;;  %s4112_s27 = smov [#allocation2]   ;;  %s4040_s9 = scalar_lea.hbm %s5400_s0, 768 }
   0x3   :  { %s21_s28 = sshll.u32 %s4112_s27, 4  ;;  %p4041_p0 = scmp.ne.s32.totalorder %s5400_s0, %s4040_s9  ;;  %s22_s28 = int_to_ptr.vmem [resolvable:$true] %s21_s28 }
   0x4   :  { %p4044_p1 = scmp.lt.u32.totalorder %s4040_s9, %s5400_s0 }
   0x6   :  { %p4046_p2 = pnand %p4044_p1, %p4041_p0 }
   0x8   :  { %4049 = shalt.err (!%p4046_p2)
}
   0x9   :  { %s4050_s14 = scalar_lea.vmem %s22_s28, 768  ;;  %p4055_p4 = scmp.lt.s32.totalorder %s22_s28, %s22_s28 }
   0xa   :  { %p4051_p3 = scmp.ne.s32.totalorder %s22_s28, %s4050_s14  ;;  %p4056_p5 = scmp.lt.s32.totalorder %s4050_s14, %s4050_s14 }
   0xc   :  { %p4057_p6 = por %p4056_p5, %p4055_p4 }
   0xe   :  { %p4058_p7 = pnand %p4057_p6, %p4051_p3 }
  0x10   :  { %4061 = shalt.err (!%p4058_p7)
}
  0x11   :  { %s4113_s15 = smov 128   ;;  %s4114_s16 = smov 8  }
  0x12   :  { %27 = dma.hbm_to_vmem [thread:$0]  %s5400_s0, 768, %s22_s28, [#allocation3], %s4113_s15, %s4113_s15, %s4114_s16  }
  0x13   :  { %s4115_s19 = smov [#allocation5]   ;;  %s4062_s23 = scalar_lea.hbm %s5401_s1, 5376 }
  0x14   :  { %s33_s20 = sshll.u32 %s4115_s19, 4  ;;  %p4063_p8 = scmp.ne.s32.totalorder %s5401_s1, %s4062_s23  ;;  %s34_s20 = int_to_ptr.vmem [resolvable:$true] %s33_s20 }
  0x15   :  { %p4066_p9 = scmp.lt.u32.totalorder %s4062_s23, %s5401_s1 }
  0x17   :  { %p4068_p10 = pnand %p4066_p9, %p4063_p8 }
  0x19   :  { %4071 = shalt.err (!%p4068_p10)
}
  0x1a   :  { %s4072_s29 = scalar_lea.vmem %s34_s20, 5376  ;;  %p4077_p12 = scmp.lt.s32.totalorder %s34_s20, %s34_s20 }
  0x1b   :  { %p4073_p11 = scmp.ne.s32.totalorder %s34_s20, %s4072_s29  ;;  %p4078_p13 = scmp.lt.s32.totalorder %s4072_s29, %s4072_s29 }
  0x1d   :  { %p4079_p0 = por %p4078_p13, %p4077_p12 }
  0x1f   :  { %p4080_p1 = pnand %p4079_p0, %p4073_p11 }
  0x21   :  { %4083 = shalt.err (!%p4080_p1)
}
  0x22   :  { %s4116_s0 = smov 256   ;;  %s4117_s28 = smov 16  }
  0x23   :  { %39 = dma.hbm_to_vmem [thread:$0]  %s5401_s1, 5376, %s34_s20, [#allocation6], %s4116_s0, %s4116_s0, %s4117_s28  }
  0x24   :  { %4106 = dma.done.wait [#allocation3], 768  }
  0x25   :  { %4107 = vsyncadd [#allocation3], 4294966528 }
  0x26   :  { %4108 = dma.done.wait [#allocation6], 5376  }
  0x27   :  { %4109 = vsyncadd [#allocation6], 4294961920  ;;  %v4191_v0 = vld [vmem:[#allocation5 + $0x4] ss:$16 sps:$4 sm:$0xff]   ;;  %v4193_v1 = vld [vmem:[#allocation5 + $0xc] ss:$16 sps:$4 sm:$0xff]  }
  0x28   :  { %423 = vmatprep.subr.bf16.mxu0 %v4191_v0  ;;  %v4196_v2 = vld [vmem:[#allocation5] ss:$16 sps:$4 sm:$0xff]   ;;  %v4198_v3 = vld [vmem:[#allocation5 + $0x8] ss:$16 sps:$4 sm:$0xff]   ;;  %464 = vmatprep.subr.bf16.mxu1 %v4193_v1  ;;  %v4201_v4 = vld [vmem:[#allocation5 + $0x24] ss:$16 sps:$4 sm:$0xff]  }
  0x29   :  { %424 = vmatpush1.bf16.msra.mxu0 %v4196_v2  ;;  %465 = vmatpush1.bf16.msra.mxu1 %v4198_v3  ;;  %v4205_v5 = vld [vmem:[#allocation5 + $0x2c] ss:$16 sps:$4 sm:$0xff]   ;;  %v4207_v6 = vld [vmem:[#allocation5 + $0x20] ss:$16 sps:$4 sm:$0xff]   ;;  %v4210_v7 = vld [vmem:[#allocation5 + $0x28] ss:$16 sps:$4 sm:$0xff]  }
  0x2a   :  { %425 = vmatprep.subr.bf16.mxu0 %v4201_v4  ;;  %466 = vmatprep.subr.bf16.mxu1 %v4205_v5  ;;  %v4213_v8 = vld [vmem:[#allocation5 + $0x44] ss:$16 sps:$4 sm:$0xff]   ;;  %v4215_v9 = vld [vmem:[#allocation5 + $0x4c] ss:$16 sps:$4 sm:$0xff]   ;;  %v4217_v10 = vld [vmem:[#allocation5 + $0x40] ss:$16 sps:$4 sm:$0xff]  }
  0x2b   :  { %v4219_v11 = vld [vmem:[#allocation5 + $0x48] ss:$16 sps:$4 sm:$0xff]   ;;  %v4223_v12 = vld [vmem:[#allocation5 + $0x64] ss:$16 sps:$4 sm:$0xff]   ;;  %v4227_v13 = vld [vmem:[#allocation5 + $0x6c] ss:$16 sps:$4 sm:$0xff]  }
  0x2c   :  { %v4229_v14 = vld [vmem:[#allocation5 + $0x60] ss:$16 sps:$4 sm:$0xff]   ;;  %v4233_v15 = vld [vmem:[#allocation5 + $0x68] ss:$16 sps:$4 sm:$0xff]   ;;  %v4235_v16 = vld [vmem:[#allocation5 + $0x84] ss:$16 sps:$4 sm:$0xff]  }
  0x2d   :  { %426 = vmatpush1.bf16.msra.mxu0 %v4207_v6  ;;  %467 = vmatpush1.bf16.msra.mxu1 %v4210_v7  ;;  %v4239_v17 = vld [vmem:[#allocation5 + $0x8c] ss:$16 sps:$4 sm:$0xff]   ;;  %v4241_v18 = vld [vmem:[#allocation5 + $0x80] ss:$16 sps:$4 sm:$0xff]   ;;  %v4243_v19 = vld [vmem:[#allocation5 + $0x88] ss:$16 sps:$4 sm:$0xff]  }
  0x2e   :  { %427 = vmatprep.subr.bf16.mxu0 %v4213_v8  ;;  %468 = vmatprep.subr.bf16.mxu1 %v4215_v9  ;;  %v4247_v20 = vld [vmem:[#allocation5 + $0xa4] ss:$16 sps:$4 sm:$0xff]   ;;  %v4251_v21 = vld [vmem:[#allocation5 + $0xac] ss:$16 sps:$4 sm:$0xff]   ;;  %v4253_v22 = vld [vmem:[#allocation5 + $0xa0] ss:$16 sps:$4 sm:$0xff]  }
  0x2f   :  { %v4257_v23 = vld [vmem:[#allocation5 + $0xa8] ss:$16 sps:$4 sm:$0xff]   ;;  %v4259_v24 = vld [vmem:[#allocation5 + $0xc4] ss:$16 sps:$4 sm:$0xff]   ;;  %v4263_v25 = vld [vmem:[#allocation5 + $0xcc] ss:$16 sps:$4 sm:$0xff]  }
  0x30   :  { %v4265_v26 = vld [vmem:[#allocation5 + $0xc0] ss:$16 sps:$4 sm:$0xff]   ;;  %v4267_v27 = vld [vmem:[#allocation5 + $0xc8] ss:$16 sps:$4 sm:$0xff]   ;;  %v4271_v28 = vld [vmem:[#allocation5 + $0xe4] ss:$16 sps:$4 sm:$0xff]  }
  0x31   :  { %428 = vmatpush1.bf16.msra.mxu0 %v4217_v10  ;;  %469 = vmatpush1.bf16.msra.mxu1 %v4219_v11  ;;  %v4275_v29 = vld [vmem:[#allocation5 + $0xec] ss:$16 sps:$4 sm:$0xff]   ;;  %v168_v30 = vld [vmem:[#allocation2] sm:$0xff]  ;;  %v4281_v32 = vld [vmem:[#allocation5 + $0xe8] ss:$16 sps:$4 sm:$0xff]   ;;  %vm406_vm0 = vcmask 326656  }
  0x32   :  { %429 = vmatprep.subr.bf16.mxu0 %v4223_v12  ;;  %470 = vmatprep.subr.bf16.mxu1 %v4227_v13  ;;  %v4279_v31 = vld [vmem:[#allocation5 + $0xe0] ss:$16 sps:$4 sm:$0xff]   ;;  %v4285_v33 = vld [vmem:[#allocation5 + $0x104] ss:$16 sps:$4 sm:$0xff]   ;;  %v4287_v34 = vld [vmem:[#allocation5 + $0x10c] ss:$16 sps:$4 sm:$0xff]   ;;  %v2638_v35 = vcombine.high %v168_v30, %v168_v30 }
  0x33   :  { %v4293_v36 = vld [vmem:[#allocation5 + $0x100] ss:$16 sps:$4 sm:$0xff]   ;;  %v4295_v37 = vld [vmem:[#allocation5 + $0x108] ss:$16 sps:$4 sm:$0xff]   ;;  %v4299_v38 = vld [vmem:[#allocation5 + $0x124] ss:$16 sps:$4 sm:$0xff]  }
  0x34   :  { %2684 = vmatprep.mubr.msk.bf16.mxu0 %vm406_vm0, %v2638_v35  ;;  %2686 = vmatprep.mubr.msk.bf16.mxu1 %vm406_vm0, %v2638_v35  ;;  %v4301_v39 = vld [vmem:[#allocation5 + $0x12c] ss:$16 sps:$4 sm:$0xff]   ;;  %v99_v40 = vld [vmem:[#allocation5 + $0x140] sm:$0xff]  ;;  %v4307_v43 = vld [vmem:[#allocation5 + $0x128] ss:$16 sps:$4 sm:$0xff]   ;;  %vm410_vm1 = vcmask 1043456   ;;  %v2637_v35 = vcombine.low %v168_v30, %v168_v30 }
  0x35   :  { %430 = vmatpush1.bf16.msra.mxu0 %v4229_v14  ;;  %471 = vmatpush1.bf16.msra.mxu1 %v4233_v15  ;;  %v100_v41 = vld [vmem:[#allocation5 + $0x148] sm:$0xff]  ;;  %v4305_v42 = vld [vmem:[#allocation5 + $0x120] ss:$16 sps:$4 sm:$0xff]   ;;  %v4309_v44 = vcombine.high %v99_v40, %v99_v40  ;;  %v2679_v46 = vcombine.low %v99_v40, %v99_v40  ;;  %v119_v49 = vld [vmem:[%s5403_s3 + $0x88] sm:$0xff]  ;;  %vm4119_vm2 = vmmov 0   ;;  %vm2514_vm3 = vcmask 523264  }
  0x36   :  { %431 = vmatprep.subr.bf16.mxu0 %v4235_v16  ;;  %472 = vmatprep.subr.bf16.mxu1 %v4239_v17  ;;  %v4313_v45 = vcombine.high %v100_v41, %v100_v41  ;;  %v2681_v47 = vcombine.low %v100_v41, %v100_v41  ;;  %v118_v48 = vld [vmem:[%s5403_s3 + $0x80] sm:$0xff]  ;;  %v2622_v51 = vld [vmem:[%s5403_s3 + $0x188] sm:$0xff]  ;;  %v120_v60 = vld [vmem:[%s5403_s3 + $0x90] sm:$0xff] }
  0x37   :  { %v2621_v50 = vld [vmem:[%s5403_s3 + $0x180] sm:$0xff]  ;;  %v103_v53 = vld [vmem:[%s5403_s3 + $0x8] sm:$0xff]  ;;  %v4340_v54 = vsel %vm410_vm1, %v2679_v46, 0  ;;  %v4345_v56 = vpack.c.bf16 %v119_v49, %v118_v48  ;;  %v121_v61 = vld [vmem:[%s5403_s3 + $0x98] sm:$0xff] }
  0x38   :  { %5532 = vst [vmem:[#allocation11_spill] sm:$0xff] %v4313_v45  ;;  %v102_v52 = vld [vmem:[%s5403_s3] sm:$0xff]  ;;  %v4343_v55 = vsel %vm410_vm1, %v2681_v47, 0  ;;  %v4347_v57 = vpack.c.bf16 %v2622_v51, %v2621_v50  ;;  %v2606_v59 = vld [vmem:[%s5403_s3 + $0x108] sm:$0xff]  ;;  %v2623_v62 = vld [vmem:[%s5403_s3 + $0x190] sm:$0xff] }
  0x39   :  { %432 = vmatpush1.bf16.msra.mxu0 %v4241_v18  ;;  %473 = vmatpush1.bf16.msra.mxu1 %v4243_v19  ;;  %5533 = vst [vmem:[#allocation12_spill] sm:$0xff] %v4343_v55  ;;  %5534 = vst [vmem:[#allocation13_spill] sm:$0xff] %v4345_v56  ;;  %v2605_v58 = vld [vmem:[%s5403_s3 + $0x100] sm:$0xff]  ;;  %v2624_v63 = vld [vmem:[%s5403_s3 + $0x198] sm:$0xff]  ;;  %v4381_v30 = vpack.c.bf16 %v103_v53, %v102_v52  ;;  %v4399_v52 = vpack.c.bf16 %v121_v61, %v120_v60 }
  0x3a   :  { %433 = vmatprep.subr.bf16.mxu0 %v4247_v20  ;;  %474 = vmatprep.subr.bf16.mxu1 %v4251_v21  ;;  %5535 = vst [vmem:[#allocation14_spill] sm:$0xff] %v4347_v57  ;;  %v104_v40 = vld [vmem:[%s5403_s3 + $0x10] sm:$0xff]  ;;  %v105_v41 = vld [vmem:[%s5403_s3 + $0x18] sm:$0xff]  ;;  %v4383_v48 = vpack.c.bf16 %v2606_v59, %v2605_v58  ;;  %v122_v49 = vld [vmem:[%s5403_s3 + $0xa0] sm:$0xff]  ;;  %v4401_v53 = vpack.c.bf16 %v2624_v63, %v2623_v62 }
  0x3b   :  { %v2607_v46 = vld [vmem:[%s5403_s3 + $0x110] sm:$0xff]  ;;  %v2608_v47 = vld [vmem:[%s5403_s3 + $0x118] sm:$0xff]  ;;  %5536 = vst [vmem:[#allocation15_spill] sm:$0xff] %v4381_v30  ;;  %v123_v50 = vld [vmem:[%s5403_s3 + $0xa8] sm:$0xff]  ;;  %v4417_v61 = vpack.c.bf16 %v105_v41, %v104_v40 }
  0x3c   :  { %5537 = vst [vmem:[#allocation16_spill] sm:$0xff] %v4383_v48  ;;  %v2625_v51 = vld [vmem:[%s5403_s3 + $0x1a0] sm:$0xff]  ;;  %5538 = vst [vmem:[#allocation17_spill] sm:$0xff] %v4399_v52  ;;  %v107_v59 = vld [vmem:[%s5403_s3 + $0x28] sm:$0xff]  ;;  %v4419_v62 = vpack.c.bf16 %v2608_v47, %v2607_v46  ;;  %v4435_v40 = vpack.c.bf16 %v123_v50, %v122_v49 }
  0x3d   :  { %434 = vmatpush1.bf16.msra.mxu0 %v4253_v22  ;;  %475 = vmatpush1.bf16.msra.mxu1 %v4257_v23  ;;  %5539 = vst [vmem:[#allocation18_spill] sm:$0xff] %v4401_v53  ;;  %v106_v58 = vld [vmem:[%s5403_s3 + $0x20] sm:$0xff]  ;;  %v2610_v60 = vld [vmem:[%s5403_s3 + $0x128] sm:$0xff]  ;;  %5540 = vst [vmem:[#allocation19_spill] sm:$0xff] %v4417_v61 }
  0x3e   :  { %435 = vmatprep.subr.bf16.mxu0 %v4259_v24  ;;  %476 = vmatprep.subr.bf16.mxu1 %v4263_v25  ;;  %5541 = vst [vmem:[#allocation20_spill] sm:$0xff] %v4419_v62  ;;  %v124_v63 = vld [vmem:[%s5403_s3 + $0xb0] sm:$0xff]  ;;  %5542 = vst [vmem:[#allocation21_spill] sm:$0xff] %v4435_v40  ;;  %v109_v47 = vld [vmem:[%s5403_s3 + $0x38] sm:$0xff] }
  0x3f   :  { %v108_v46 = vld [vmem:[%s5403_s3 + $0x30] sm:$0xff]  ;;  %v126_v50 = vld [vmem:[%s5403_s3 + $0xc0] sm:$0xff] }
  0x41   :  { %436 = vmatpush1.bf16.msra.mxu0 %v4265_v26  ;;  %477 = vmatpush1.bf16.msra.mxu1 %v4267_v27 }
  0x42   :  { %437 = vmatprep.subr.bf16.mxu0 %v4271_v28  ;;  %478 = vmatprep.subr.bf16.mxu1 %v4275_v29 }
  0x45   :  { %438 = vmatpush1.bf16.msra.mxu0 %v4279_v31  ;;  %479 = vmatpush1.bf16.msra.mxu1 %v4281_v32 }
  0x46   :  { %439 = vmatprep.subr.bf16.mxu0 %v4285_v33  ;;  %480 = vmatprep.subr.bf16.mxu1 %v4287_v34 }
  0x49   :  { %440 = vmatpush1.bf16.msra.mxu0 %v4293_v36  ;;  %481 = vmatpush1.bf16.msra.mxu1 %v4295_v37 }
  0x4a   :  { %441 = vmatprep.subr.bf16.mxu0 %v4299_v38  ;;  %482 = vmatprep.subr.bf16.mxu1 %v4301_v39 }
  0x4d   :  { %442 = vmatpush1.bf16.msra.mxu0 %v4305_v42  ;;  %483 = vmatpush1.bf16.msra.mxu1 %v4307_v43 }
  0x4e   :  { %2683 = vmatprep.subr.msk.bf16.mxu0 %vm410_vm1, %v4309_v44  ;;  %2685 = vmatprep.subr.msk.bf16.mxu1 %vm410_vm1, %v4313_v45 }
  0x51   :  { %444 = vmatpush1.bf16.msra.mxu0 %v4340_v54  ;;  %485 = vmatpush1.bf16.msra.mxu1 %v4343_v55  ;;  %v2626_v55 = vld [vmem:[%s5403_s3 + $0x1a8] sm:$0xff] }
  0x52   :  { %3471 = vmatprep.subr.bf16.mxu0 %v4345_v56  ;;  %3503 = vmatprep.subr.bf16.mxu1 %v4347_v57  ;;  %v2609_v56 = vld [vmem:[%s5403_s3 + $0x120] sm:$0xff]  ;;  %v2627_v57 = vld [vmem:[%s5403_s3 + $0x1b0] sm:$0xff]  ;;  %v4437_v41 = vpack.c.bf16 %v2626_v55, %v2625_v51  ;;  %v4453_v55 = vpack.c.bf16 %v107_v59, %v106_v58  ;;  %v127_v51 = vld [vmem:[%s5403_s3 + $0xc8] sm:$0xff] }
  0x53   :  { %v4455_v49 = vpack.c.bf16 %v2610_v60, %v2609_v56  ;;  %v110_v59 = vld [vmem:[%s5403_s3 + $0x40] sm:$0xff]  ;;  %v111_v60 = vld [vmem:[%s5403_s3 + $0x48] sm:$0xff] }
  0x54   :  { %456 = vmatmul.mubr.bf16.vlgmr.msra.gmra.mrb[0].mxu0 %v2637_v35  ;;  %497 = vmatmul.mubr.bf16.vlgmr.msra.gmra.mrb[0].mxu1 %v2637_v35  ;;  %v125_v35 = vld [vmem:[%s5403_s3 + $0xb8] sm:$0xff]  ;;  %5543 = vst [vmem:[#allocation22_spill] sm:$0xff] %v4437_v41  ;;  %5544 = vst [vmem:[#allocation23_spill] sm:$0xff] %v4453_v55 }
  0x55   :  { %3473 = vmatpush3.bf16.msra.mxu0 %v4381_v30  ;;  %3505 = vmatpush3.bf16.msra.mxu1 %v4383_v48  ;;  %v2628_v30 = vld [vmem:[%s5403_s3 + $0x1b8] sm:$0xff]  ;;  %v2611_v48 = vld [vmem:[%s5403_s3 + $0x130] sm:$0xff]  ;;  %5545 = vst [vmem:[#allocation24_spill] sm:$0xff] %v4455_v49  ;;  %v4471_v56 = vpack.c.bf16 %v125_v35, %v124_v63 }
  0x56   :  { %3475 = vmatprep.subr.bf16.mxu0 %v4399_v52  ;;  %3507 = vmatprep.subr.bf16.mxu1 %v4401_v53  ;;  %v2612_v52 = vld [vmem:[%s5403_s3 + $0x138] sm:$0xff]  ;;  %v2629_v53 = vld [vmem:[%s5403_s3 + $0x1c0] sm:$0xff]  ;;  %v4473_v58 = vpack.c.bf16 %v2628_v30, %v2627_v57  ;;  %v4489_v57 = vpack.c.bf16 %v109_v47, %v108_v46  ;;  %v128_v63 = vld [vmem:[%s5403_s3 + $0xd0] sm:$0xff] }
  0x57   :  { %5546 = vst [vmem:[#allocation25_spill] sm:$0xff] %v4471_v56  ;;  %v4491_v30 = vpack.c.bf16 %v2612_v52, %v2611_v48  ;;  %v129_v35 = vld [vmem:[%s5403_s3 + $0xd8] sm:$0xff]  ;;  %v4507_v48 = vpack.c.bf16 %v127_v51, %v126_v50  ;;  %v112_v46 = vld [vmem:[%s5403_s3 + $0x50] sm:$0xff] }
  0x58   :  { %5547 = vst [vmem:[#allocation26_spill] sm:$0xff] %v4473_v58  ;;  %5548 = vst [vmem:[#allocation27_spill] sm:$0xff] %v4489_v57  ;;  %v113_v47 = vld [vmem:[%s5403_s3 + $0x58] sm:$0xff]  ;;  %v4531_v50 = vpack.c.bf16 %v129_v35, %v128_v63  ;;  %v2617_v35 = vld [vmem:[%s5403_s3 + $0x160] sm:$0xff] }
  0x59   :  { %3477 = vmatpush3.bf16.msra.mxu0 %v4417_v61  ;;  %3509 = vmatpush3.bf16.msra.mxu1 %v4419_v62  ;;  %v2630_v61 = vld [vmem:[%s5403_s3 + $0x1c8] sm:$0xff]  ;;  %v2613_v62 = vld [vmem:[%s5403_s3 + $0x140] sm:$0xff]  ;;  %5549 = vst [vmem:[#allocation28_spill] sm:$0xff] %v4491_v30  ;;  %5550 = vst [vmem:[#allocation29_spill] sm:$0xff] %v4507_v48 }
  0x5a   :  { %3479 = vmatprep.subr.bf16.mxu0 %v4435_v40  ;;  %3511 = vmatprep.subr.bf16.mxu1 %v4437_v41  ;;  %v2614_v40 = vld [vmem:[%s5403_s3 + $0x148] sm:$0xff]  ;;  %v2631_v41 = vld [vmem:[%s5403_s3 + $0x1d0] sm:$0xff]  ;;  %v4509_v52 = vpack.c.bf16 %v2630_v61, %v2629_v53  ;;  %v4525_v53 = vpack.c.bf16 %v111_v60, %v110_v59  ;;  %5554 = vst [vmem:[#allocation33_spill] sm:$0xff] %v4531_v50 }
  0x5b   :  { %v4527_v61 = vpack.c.bf16 %v2614_v40, %v2613_v62  ;;  %v130_v62 = vld [vmem:[%s5403_s3 + $0xe0] sm:$0xff]  ;;  %v131_v40 = vld [vmem:[%s5403_s3 + $0xe8] sm:$0xff] }
  0x5c   :  { %5551 = vst [vmem:[#allocation30_spill] sm:$0xff] %v4509_v52  ;;  %5552 = vst [vmem:[#allocation31_spill] sm:$0xff] %v4525_v53  ;;  %v115_v59 = vld [vmem:[%s5403_s3 + $0x68] sm:$0xff] }
  0x5d   :  { %3481 = vmatpush3.bf16.msra.mxu0 %v4453_v55  ;;  %3513 = vmatpush3.bf16.msra.mxu1 %v4455_v49  ;;  %v2632_v55 = vld [vmem:[%s5403_s3 + $0x1d8] sm:$0xff]  ;;  %v2615_v49 = vld [vmem:[%s5403_s3 + $0x150] sm:$0xff]  ;;  %5553 = vst [vmem:[#allocation32_spill] sm:$0xff] %v4527_v61 }
  0x5e   :  { %3483 = vmatprep.subr.bf16.mxu0 %v4471_v56  ;;  %3515 = vmatprep.subr.bf16.mxu1 %v4473_v58  ;;  %v2616_v56 = vld [vmem:[%s5403_s3 + $0x158] sm:$0xff]  ;;  %v4533_v51 = vpack.c.bf16 %v2632_v55, %v2631_v41  ;;  %v4537_v58 = vpack.c.bf16 %v113_v47, %v112_v46  ;;  %v2633_v41 = vld [vmem:[%s5403_s3 + $0x1e0] sm:$0xff]  ;;  %v4554_v55 = vpack.c.bf16 %v131_v40, %v130_v62  ;;  %v2618_v46 = vld [vmem:[%s5403_s3 + $0x168] sm:$0xff] }
  0x5f   :  { %v4576_v47 = vpack.c.bf16 %v2618_v46, %v2617_v35  ;;  %v132_v62 = vld [vmem:[%s5403_s3 + $0xf0] sm:$0xff]  ;;  %v133_v40 = vld [vmem:[%s5403_s3 + $0xf8] sm:$0xff] }
  0x60   :  { %5555 = vst [vmem:[#allocation34_spill] sm:$0xff] %v4533_v51  ;;  %5556 = vst [vmem:[#allocation35_spill] sm:$0xff] %v4537_v58  ;;  %v117_v35 = vld [vmem:[%s5403_s3 + $0x78] sm:$0xff] }
  0x61   :  { %3485 = vmatpush3.bf16.msra.mxu0 %v4489_v57  ;;  %3517 = vmatpush3.bf16.msra.mxu1 %v4491_v30  ;;  %v4539_v57 = vpack.c.bf16 %v2616_v56, %v2615_v49  ;;  %5558 = vst [vmem:[#allocation37_spill] sm:$0xff] %v4554_v55  ;;  %v2634_v49 = vld [vmem:[%s5403_s3 + $0x1e8] sm:$0xff]  ;;  %v114_v56 = vld [vmem:[%s5403_s3 + $0x60] sm:$0xff]  ;;  %5561 = vst [vmem:[#allocation40_spill] sm:$0xff] %v4576_v47 }
  0x62   :  { %3487 = vmatprep.subr.bf16.mxu0 %v4507_v48  ;;  %3519 = vmatprep.subr.bf16.mxu1 %v4509_v52  ;;  %v4565_v60 = vpack.c.bf16 %v2634_v49, %v2633_v41  ;;  %v4567_v63 = vpack.c.bf16 %v115_v59, %v114_v56  ;;  %v2635_v41 = vld [vmem:[%s5403_s3 + $0x1f0] sm:$0xff]  ;;  %v4590_v49 = vpack.c.bf16 %v133_v40, %v132_v62  ;;  %v2636_v56 = vld [vmem:[%s5403_s3 + $0x1f8] sm:$0xff]  ;;  %v670_v52 = vld [vmem:[#allocation2 + $0x8] sm:$0xff] }
  0x63   :  { %5557 = vst [vmem:[#allocation36_spill] sm:$0xff] %v4539_v57  ;;  %v116_v59 = vld [vmem:[%s5403_s3 + $0x70] sm:$0xff]  ;;  %v4601_v46 = vpack.c.bf16 %v2636_v56, %v2635_v41  ;;  %v2620_v40 = vld [vmem:[%s5403_s3 + $0x178] sm:$0xff]  ;;  %v170_v41 = vlaneseq }
  0x64   :  { %5559 = vst [vmem:[#allocation38_spill] sm:$0xff] %v4565_v60  ;;  %5560 = vst [vmem:[#allocation39_spill] sm:$0xff] %v4567_v63  ;;  %v2619_v62 = vld [vmem:[%s5403_s3 + $0x170] sm:$0xff] }
  0x65   :  { %3489 = vmatpush3.bf16.msra.mxu0 %v4525_v53  ;;  %3521 = vmatpush3.bf16.msra.mxu1 %v4527_v61  ;;  %5562 = vst [vmem:[#allocation41_spill] sm:$0xff] %v4590_v49  ;;  %5563 = vst [vmem:[#allocation42_spill] sm:$0xff] %v4601_v46  ;;  %v171_v56 = vshrl.u32 %v170_v41, 7 }
  0x66   :  { %3491 = vmatprep.subr.bf16.mxu0 %v4531_v50  ;;  %3523 = vmatprep.subr.bf16.mxu1 %v4533_v51 }
  0x69   :  { %3493 = vmatpush3.bf16.msra.mxu0 %v4537_v58  ;;  %3525 = vmatpush3.bf16.msra.mxu1 %v4539_v57 }
  0x6a   :  { %3495 = vmatprep.subr.bf16.mxu0 %v4554_v55  ;;  %3527 = vmatprep.subr.bf16.mxu1 %v4565_v60 }
  0x6d   :  { %3497 = vmatpush3.bf16.msra.mxu0 %v4567_v63  ;;  %3529 = vmatpush3.bf16.msra.mxu1 %v4576_v47  ;;  %v4603_v63 = vpack.c.bf16 %v117_v35, %v116_v59  ;;  %v4612_v47 = vpack.c.bf16 %v2620_v40, %v2619_v62  ;;  %v172_v59 = vsub.s32 0, %v171_v56  ;;  %v180_v35 = vsub.s32 2, %v171_v56 }
  0x6e   :  { %3499 = vmatprep.subr.bf16.mxu0 %v4590_v49  ;;  %3531 = vmatprep.subr.bf16.mxu1 %v4601_v46  ;;  %v101_v49 = vld [vmem:[%s5402_s2] sm:$0xf]  ;;  %v176_v62 = vsub.s32 1, %v171_v56  ;;  %v184_v40 = vsub.s32 3, %v171_v56 }
  0x6f   :  { %5564 = vst [vmem:[#allocation43_spill] sm:$0xff] %v4603_v63  ;;  %5565 = vst [vmem:[#allocation44_spill] sm:$0xff] %v4612_v47  ;;  %v4622_v55 = vrot.slane %v101_v49, %v172_v59  ;;  %v4624_v46 = vrot.slane %v101_v49, %v180_v35 }
  0x71   :  { %3501 = vmatpush3.bf16.msra.mxu0 %v4603_v63  ;;  %3533 = vmatpush3.bf16.msra.mxu1 %v4612_v47  ;;  %v4626_v63 = vrot.slane %v101_v49, %v176_v62  ;;  %v4628_v47 = vrot.slane %v101_v49, %v184_v40 }
  0x72   :  { %680 = vmatprep.subr.bf16.mxu0 %v4191_v0  ;;  %721 = vmatprep.subr.bf16.mxu1 %v4193_v1 }
 0x127   :  { %v457_v0 = vpop.f32.mrb[0].mxu0  ;;  %v498_v1 = vpop.f32.mrb[0].mxu1 }
 0x128   :  { %v458_v41 = vadd.f32 %v457_v0, %v4622_v55  ;;  %v499_v60 = vadd.f32 %v498_v1, %v4624_v46  ;;  %v459_v58 = vpop.f32.mrb[1].mxu0  ;;  %v500_v57 = vpop.f32.mrb[1].mxu1  ;;  %v2688_v0 = vcombine.high %v670_v52, %v670_v52 }
 0x129   :  { %v460_v50 = vadd.f32 %v459_v58, %v4626_v63  ;;  %v501_v56 = vadd.f32 %v500_v57, %v4628_v47  ;;  %v461_v59 = vpop.f32.mrb[2].mxu0  ;;  %v502_v51 = vpop.f32.mrb[2].mxu1  ;;  %v5592_v58 = vld [vmem:[#allocation37_spill] sm:$0xff]  ;;  %v5593_v57 = vld [vmem:[#allocation40_spill] sm:$0xff] }
 0x12a   :  { %v505_v35 = vmax.f32 %v458_v41, 0.0  ;;  %v507_v53 = vmax.f32 %v499_v60, 0.0  ;;  %v462_v62 = vpop.f32.mrb[3].mxu0  ;;  %v503_v61 = vpop.f32.mrb[3].mxu1 }
 0x12b   :  { %v506_v49 = vmax.f32 %v460_v50, 0.0  ;;  %v508_v40 = vmax.f32 %v501_v56, 0.0  ;;  %v5598_v61 = vld [vmem:[#allocation43_spill] sm:$0xff]  ;;  %v5475_v50 = vmov 0.0  }
 0x12c   :  { %v509_v48 = vmax.f32 %v505_v35, %v507_v53  ;;  %v5597_v53 = vld [vmem:[#allocation44_spill] sm:$0xff] }
 0x12d   :  { %v510_v30 = vmax.f32 %v506_v49, %v508_v40 }
 0x12f   :  { %575 = vmatprep.mubr.f32.mxu0 %v510_v30  ;;  %645 = vmatprep.mubr.f32.mxu1 %v510_v30  ;;  %v5594_v30 = vld [vmem:[#allocation39_spill] sm:$0xff] }
 0x130   :  { %576 = vmatmul.mubr.f32.vlgmr.msra.gmra.mrb[4].mxu0 %v509_v48  ;;  %646 = vmatmul.mubr.f32.vlgmr.msra.gmra.mrb[4].mxu1 %v509_v48  ;;  %v5595_v48 = vld [vmem:[#allocation42_spill] sm:$0xff] }
 0x131   :  { %681 = vmatpush1.bf16.msra.mxu0 %v4196_v2  ;;  %722 = vmatpush1.bf16.msra.mxu1 %v4198_v3  ;;  %v2687_v2 = vcombine.low %v670_v52, %v670_v52  ;;  %v5566_v3 = vld [vmem:[#allocation12_spill] sm:$0xff]  ;;  %v5596_v52 = vld [vmem:[#allocation41_spill] sm:$0xff] }
 0x132   :  { %682 = vmatprep.subr.bf16.mxu0 %v4201_v4  ;;  %723 = vmatprep.subr.bf16.mxu1 %v4205_v5  ;;  %v5567_v4 = vld [vmem:[#allocation14_spill] sm:$0xff]  ;;  %v5568_v5 = vld [vmem:[#allocation13_spill] sm:$0xff] }
 0x133   :  { %2690 = vmatprep.mubr.msk.bf16.mxu0 %vm406_vm0, %v2688_v0  ;;  %2692 = vmatprep.mubr.msk.bf16.mxu1 %vm406_vm0, %v2688_v0 }
 0x135   :  { %683 = vmatpush1.bf16.msra.mxu0 %v4207_v6  ;;  %724 = vmatpush1.bf16.msra.mxu1 %v4210_v7  ;;  %v5569_v6 = vld [vmem:[#allocation16_spill] sm:$0xff]  ;;  %v5570_v7 = vld [vmem:[#allocation15_spill] sm:$0xff] }
 0x136   :  { %684 = vmatprep.subr.bf16.mxu0 %v4213_v8  ;;  %725 = vmatprep.subr.bf16.mxu1 %v4215_v9  ;;  %v5571_v8 = vld [vmem:[#allocation18_spill] sm:$0xff]  ;;  %v5572_v9 = vld [vmem:[#allocation17_spill] sm:$0xff] }
 0x139   :  { %685 = vmatpush1.bf16.msra.mxu0 %v4217_v10  ;;  %726 = vmatpush1.bf16.msra.mxu1 %v4219_v11  ;;  %v5573_v10 = vld [vmem:[#allocation20_spill] sm:$0xff]  ;;  %v5574_v11 = vld [vmem:[#allocation19_spill] sm:$0xff] }
 0x13a   :  { %686 = vmatprep.subr.bf16.mxu0 %v4223_v12  ;;  %727 = vmatprep.subr.bf16.mxu1 %v4227_v13  ;;  %v5575_v12 = vld [vmem:[#allocation22_spill] sm:$0xff]  ;;  %v5576_v13 = vld [vmem:[#allocation21_spill] sm:$0xff] }
 0x13d   :  { %687 = vmatpush1.bf16.msra.mxu0 %v4229_v14  ;;  %728 = vmatpush1.bf16.msra.mxu1 %v4233_v15  ;;  %v5577_v14 = vld [vmem:[#allocation24_spill] sm:$0xff]  ;;  %v5578_v15 = vld [vmem:[#allocation23_spill] sm:$0xff] }
 0x13e   :  { %688 = vmatprep.subr.bf16.mxu0 %v4235_v16  ;;  %729 = vmatprep.subr.bf16.mxu1 %v4239_v17  ;;  %v5579_v16 = vld [vmem:[#allocation26_spill] sm:$0xff]  ;;  %v5580_v17 = vld [vmem:[#allocation25_spill] sm:$0xff] }
 0x141   :  { %689 = vmatpush1.bf16.msra.mxu0 %v4241_v18  ;;  %730 = vmatpush1.bf16.msra.mxu1 %v4243_v19  ;;  %v5581_v18 = vld [vmem:[#allocation28_spill] sm:$0xff] }
 0x142   :  { %690 = vmatprep.subr.bf16.mxu0 %v4247_v20  ;;  %731 = vmatprep.subr.bf16.mxu1 %v4251_v21  ;;  %v5582_v20 = vld [vmem:[#allocation27_spill] sm:$0xff] }
 0x145   :  { %691 = vmatpush1.bf16.msra.mxu0 %v4253_v22  ;;  %732 = vmatpush1.bf16.msra.mxu1 %v4257_v23  ;;  %v5583_v22 = vld [vmem:[#allocation30_spill] sm:$0xff] }
 0x146   :  { %692 = vmatprep.subr.bf16.mxu0 %v4259_v24  ;;  %733 = vmatprep.subr.bf16.mxu1 %v4263_v25  ;;  %v5584_v24 = vld [vmem:[#allocation29_spill] sm:$0xff] }
 0x149   :  { %693 = vmatpush1.bf16.msra.mxu0 %v4265_v26  ;;  %734 = vmatpush1.bf16.msra.mxu1 %v4267_v27  ;;  %v5585_v26 = vld [vmem:[#allocation32_spill] sm:$0xff] }
 0x14a   :  { %694 = vmatprep.subr.bf16.mxu0 %v4271_v28  ;;  %735 = vmatprep.subr.bf16.mxu1 %v4275_v29  ;;  %v5586_v28 = vld [vmem:[#allocation31_spill] sm:$0xff] }
 0x14d   :  { %695 = vmatpush1.bf16.msra.mxu0 %v4279_v31  ;;  %736 = vmatpush1.bf16.msra.mxu1 %v4281_v32  ;;  %v5587_v31 = vld [vmem:[#allocation34_spill] sm:$0xff] }
 0x14e   :  { %696 = vmatprep.subr.bf16.mxu0 %v4285_v33  ;;  %737 = vmatprep.subr.bf16.mxu1 %v4287_v34  ;;  %v5588_v33 = vld [vmem:[#allocation33_spill] sm:$0xff] }
 0x151   :  { %697 = vmatpush1.bf16.msra.mxu0 %v4293_v36  ;;  %738 = vmatpush1.bf16.msra.mxu1 %v4295_v37  ;;  %v5589_v36 = vld [vmem:[#allocation36_spill] sm:$0xff] }
 0x152   :  { %698 = vmatprep.subr.bf16.mxu0 %v4299_v38  ;;  %739 = vmatprep.subr.bf16.mxu1 %v4301_v39  ;;  %v5590_v38 = vld [vmem:[#allocation35_spill] sm:$0xff] }
 0x155   :  { %699 = vmatpush1.bf16.msra.mxu0 %v4305_v42  ;;  %740 = vmatpush1.bf16.msra.mxu1 %v4307_v43  ;;  %v5591_v42 = vld [vmem:[#allocation38_spill] sm:$0xff] }
 0x156   :  { %2689 = vmatprep.subr.msk.bf16.mxu0 %vm410_vm1, %v4309_v44  ;;  %2691 = vmatprep.subr.msk.bf16.mxu1 %vm410_vm1, %v4313_v45 }
 0x159   :  { %701 = vmatpush1.bf16.msra.mxu0 %v4340_v54  ;;  %742 = vmatpush1.bf16.msra.mxu1 %v5566_v3 }
 0x15a   :  { %3567 = vmatprep.subr.bf16.mxu1 %v5567_v4  ;;  %3535 = vmatprep.subr.bf16.mxu0 %v5568_v5 }
 0x15c   :  { %713 = vmatmul.mubr.bf16.vlgmr.msra.gmra.mrb[8].mxu0 %v2687_v2  ;;  %754 = vmatmul.mubr.bf16.vlgmr.msra.gmra.mrb[8].mxu1 %v2687_v2 }
 0x15d   :  { %3569 = vmatpush3.bf16.msra.mxu1 %v5569_v6  ;;  %3537 = vmatpush3.bf16.msra.mxu0 %v5570_v7 }
 0x15e   :  { %3571 = vmatprep.subr.bf16.mxu1 %v5571_v8  ;;  %3539 = vmatprep.subr.bf16.mxu0 %v5572_v9 }
 0x161   :  { %3573 = vmatpush3.bf16.msra.mxu1 %v5573_v10  ;;  %3541 = vmatpush3.bf16.msra.mxu0 %v5574_v11 }
 0x162   :  { %3575 = vmatprep.subr.bf16.mxu1 %v5575_v12  ;;  %3543 = vmatprep.subr.bf16.mxu0 %v5576_v13 }
 0x165   :  { %3577 = vmatpush3.bf16.msra.mxu1 %v5577_v14  ;;  %3545 = vmatpush3.bf16.msra.mxu0 %v5578_v15 }
 0x166   :  { %3579 = vmatprep.subr.bf16.mxu1 %v5579_v16  ;;  %3547 = vmatprep.subr.bf16.mxu0 %v5580_v17 }
 0x169   :  { %3581 = vmatpush3.bf16.msra.mxu1 %v5581_v18  ;;  %3549 = vmatpush3.bf16.msra.mxu0 %v5582_v20 }
 0x16a   :  { %3583 = vmatprep.subr.bf16.mxu1 %v5583_v22  ;;  %3551 = vmatprep.subr.bf16.mxu0 %v5584_v24 }
 0x16d   :  { %3585 = vmatpush3.bf16.msra.mxu1 %v5585_v26  ;;  %3553 = vmatpush3.bf16.msra.mxu0 %v5586_v28 }
 0x16e   :  { %3587 = vmatprep.subr.bf16.mxu1 %v5587_v31  ;;  %3555 = vmatprep.subr.bf16.mxu0 %v5588_v33 }
 0x171   :  { %3589 = vmatpush3.bf16.msra.mxu1 %v5589_v36  ;;  %3557 = vmatpush3.bf16.msra.mxu0 %v5590_v38 }
 0x172   :  { %3591 = vmatprep.subr.bf16.mxu1 %v5591_v42  ;;  %3559 = vmatprep.subr.bf16.mxu0 %v5592_v58 }
 0x175   :  { %3593 = vmatpush3.bf16.msra.mxu1 %v5593_v57  ;;  %3561 = vmatpush3.bf16.msra.mxu0 %v5594_v30 }
 0x176   :  { %3595 = vmatprep.subr.bf16.mxu1 %v5595_v48  ;;  %3563 = vmatprep.subr.bf16.mxu0 %v5596_v52 }
 0x179   :  { %3597 = vmatpush3.bf16.msra.mxu1 %v5597_v53  ;;  %3565 = vmatpush3.bf16.msra.mxu0 %v5598_v61 }
 0x17a   :  { %3351 = vmatprep.subr.bf16.mxu1 %v5475_v50  ;;  %3331 = vmatprep.subr.bf16.mxu0 %v5475_v50 }
 0x203   :  { %v2880_v51 = vpop.f32.mrb[4].mxu0  ;;  %v2915_v60 = vpop.f32.mrb[4].mxu1 }
 0x204   :  { %v2881_v1 = vpop.f32.mrb[5].mxu0  ;;  %v2916_v41 = vpop.f32.mrb[5].mxu1 }
 0x205   :  { %v2882_v56 = vadd.f32 %v2881_v1, %v2880_v51  ;;  %v2917_v59 = vadd.f32 %v2916_v41, %v2915_v60 }
 0x207   :  { %v4714_v35 = vmax.f32 %v2882_v56, %v2917_v59 }
 0x22f   :  { %v714_v62 = vpop.f32.mrb[8].mxu0  ;;  %v755_v49 = vpop.f32.mrb[8].mxu1 }
 0x230   :  { %v715_v40 = vadd.f32 %v714_v62, %v4622_v55  ;;  %v756_v0 = vadd.f32 %v755_v49, %v4624_v46  ;;  %v716_v2 = vpop.f32.mrb[9].mxu0  ;;  %v757_v61 = vpop.f32.mrb[9].mxu1  ;;  %v3944_v62 = vld [vmem:[%s5404_s4] sm:$0xff]  }
 0x231   :  { %v717_v52 = vadd.f32 %v716_v2, %v4626_v63  ;;  %v758_v50 = vadd.f32 %v757_v61, %v4628_v47  ;;  %v718_v30 = vpop.f32.mrb[10].mxu0  ;;  %v759_v58 = vpop.f32.mrb[10].mxu1  ;;  %v3952_v49 = vld [vmem:[%s5404_s4 + $0x40] sm:$0xff]   ;;  %v3947_v61 = vld [vmem:[%s5404_s4 + $0x18] sm:$0xff]   ;;  %v3949_v2 = vld [vmem:[%s5404_s4 + $0x28] sm:$0xff]  }
 0x232   :  { %v762_v38 = vmax.f32 %v715_v40, 0.0  ;;  %v764_v33 = vmax.f32 %v756_v0, 0.0  ;;  %v719_v51 = vpop.f32.mrb[11].mxu0  ;;  %v760_v60 = vpop.f32.mrb[11].mxu1  ;;  %v3945_v58 = vld [vmem:[%s5404_s4 + $0x8] sm:$0xff]   ;;  %v3946_v30 = vld [vmem:[%s5404_s4 + $0x10] sm:$0xff]  }
 0x233   :  { %v763_v1 = vmax.f32 %v717_v52, 0.0  ;;  %v765_v41 = vmax.f32 %v758_v50, 0.0  ;;  %v3954_v52 = vld [vmem:[%s5404_s4 + $0x50] sm:$0xff]   ;;  %v3955_v50 = vld [vmem:[%s5404_s4 + $0x58] sm:$0xff]   ;;  %v3948_v40 = vld [vmem:[%s5404_s4 + $0x20] sm:$0xff]  }
 0x234   :  { %v766_v56 = vmax.f32 %v762_v38, %v764_v33  ;;  %v5599_v33 = vmov 0.0   ;;  %v3953_v38 = vld [vmem:[%s5404_s4 + $0x48] sm:$0xff]   ;;  %v3956_v0 = vld [vmem:[%s5404_s4 + $0x60] sm:$0xff]   ;;  %v3950_v60 = vld [vmem:[%s5404_s4 + $0x30] sm:$0xff]  }
 0x235   :  { %v767_v59 = vmax.f32 %v763_v1, %v765_v41  ;;  %v3957_v51 = vld [vmem:[%s5404_s4 + $0x68] sm:$0xff]   ;;  %v3951_v1 = vld [vmem:[%s5404_s4 + $0x38] sm:$0xff]   ;;  %v652_v41 = vpack.c.bf16 %v4714_v35, %v4714_v35 }
 0x236   :  { %v4796_v35 = vld [vmem:[#allocation5 + $0x48] ss:$16 sps:$4 sm:$0xff]  }
 0x237   :  { %832 = vmatprep.mubr.f32.mxu0 %v767_v59  ;;  %902 = vmatprep.mubr.f32.mxu1 %v767_v59  ;;  %v4784_v59 = vld [vmem:[#allocation5 + $0x8] ss:$16 sps:$4 sm:$0xff]   ;;  %5602 = vst [vmem:[#allocation17_spill] sm:$0xff] %v4796_v35 }
 0x238   :  { %833 = vmatmul.mubr.f32.vlgmr.msra.gmra.mrb[6].mxu0 %v766_v56  ;;  %903 = vmatmul.mubr.f32.vlgmr.msra.gmra.mrb[6].mxu1 %v766_v56  ;;  %v4781_v56 = vld [vmem:[#allocation5 + $0xc] ss:$16 sps:$4 sm:$0xff]  }
 0x239   :  { %3352 = vmatpush3.bf16.msra.mxu1 %v3944_v62  ;;  %3367 = vmatprep.mubr.msk.bf16.mxu1 %vm4119_vm2, %v5599_v33  ;;  %v4787_v62 = vld [vmem:[#allocation5 + $0x2c] ss:$16 sps:$4 sm:$0xff]  }
 0x23a   :  { %3353 = vmatprep.subr.bf16.mxu1 %v5599_v33  ;;  %3332 = vmatpush3.bf16.msra.mxu0 %v3952_v49  ;;  %v4790_v49 = vld [vmem:[#allocation5 + $0x28] ss:$16 sps:$4 sm:$0xff]  }
 0x23b   :  { %3333 = vmatprep.subr.bf16.mxu0 %v5599_v33  ;;  %3347 = vmatprep.mubr.msk.bf16.mxu0 %vm4119_vm2, %v5599_v33  ;;  %5600 = vst [vmem:[#allocation13_spill] sm:$0xff] %v4790_v49 }
 0x23d   :  { %3354 = vmatpush3.bf16.msra.mxu1 %v3945_v58  ;;  %v4793_v58 = vld [vmem:[#allocation5 + $0x4c] ss:$16 sps:$4 sm:$0xff]  }
 0x23e   :  { %3355 = vmatprep.subr.bf16.mxu1 %v5599_v33  ;;  %3334 = vmatpush3.bf16.msra.mxu0 %v3953_v38  ;;  %5601 = vst [vmem:[#allocation15_spill] sm:$0xff] %v4793_v58  ;;  %v4799_v38 = vld [vmem:[#allocation5 + $0x6c] ss:$16 sps:$4 sm:$0xff]  }
 0x23f   :  { %3335 = vmatprep.subr.bf16.mxu0 %v5599_v33  ;;  %5603 = vst [vmem:[#allocation19_spill] sm:$0xff] %v4799_v38 }
 0x241   :  { %3356 = vmatpush3.bf16.msra.mxu1 %v3946_v30  ;;  %v4802_v30 = vld [vmem:[#allocation5 + $0x68] ss:$16 sps:$4 sm:$0xff]  }
 0x242   :  { %3357 = vmatprep.subr.bf16.mxu1 %v5599_v33  ;;  %3336 = vmatpush3.bf16.msra.mxu0 %v3954_v52  ;;  %5604 = vst [vmem:[#allocation21_spill] sm:$0xff] %v4802_v30  ;;  %v4805_v52 = vld [vmem:[#allocation5 + $0x8c] ss:$16 sps:$4 sm:$0xff]  }
 0x243   :  { %3337 = vmatprep.subr.bf16.mxu0 %v5599_v33  ;;  %5605 = vst [vmem:[#allocation23_spill] sm:$0xff] %v4805_v52 }
 0x245   :  { %3358 = vmatpush3.bf16.msra.mxu1 %v3947_v61 }
 0x246   :  { %3359 = vmatprep.subr.bf16.mxu1 %v5599_v33  ;;  %3338 = vmatpush3.bf16.msra.mxu0 %v3955_v50 }
 0x247   :  { %3339 = vmatprep.subr.bf16.mxu0 %v5599_v33 }
 0x249   :  { %3360 = vmatpush3.bf16.msra.mxu1 %v3948_v40 }
 0x24a   :  { %3361 = vmatprep.subr.bf16.mxu1 %v5599_v33  ;;  %3340 = vmatpush3.bf16.msra.mxu0 %v3956_v0  ;;  %v4853_v0 = vld [vmem:[#allocation5] ss:$16 sps:$4 sm:$0xff]  }
 0x24b   :  { %3341 = vmatprep.subr.bf16.mxu0 %v5599_v33 }
 0x24d   :  { %3362 = vmatpush3.bf16.msra.mxu1 %v3949_v2  ;;  %v4857_v2 = vld [vmem:[#allocation5 + $0x24] ss:$16 sps:$4 sm:$0xff]  }
 0x24e   :  { %3363 = vmatprep.subr.bf16.mxu1 %v5599_v33  ;;  %3342 = vmatpush3.bf16.msra.mxu0 %v3957_v51  ;;  %v4860_v51 = vld [vmem:[#allocation5 + $0x20] ss:$16 sps:$4 sm:$0xff]  }
 0x24f   :  { %3343 = vmatprep.subr.bf16.mxu0 %v5599_v33 }
 0x251   :  { %3364 = vmatpush3.bf16.msra.mxu1 %v3950_v60  ;;  %v4863_v60 = vld [vmem:[#allocation5 + $0x44] ss:$16 sps:$4 sm:$0xff]  }
 0x252   :  { %3365 = vmatprep.subr.bf16.mxu1 %v5599_v33 }
 0x255   :  { %3366 = vmatpush3.bf16.msra.mxu1 %v3951_v1  ;;  %v4866_v1 = vld [vmem:[#allocation5 + $0x40] ss:$16 sps:$4 sm:$0xff]  }
 0x256   :  { %1155 = vmatprep.subr.bf16.mxu1 %v4781_v56 }
 0x258   :  { %3368 = vmatmul.mubr.bf16.vlgmr.msra.gmra.mrb[12].mxu1 %v652_v41  ;;  %v4869_v41 = vld [vmem:[#allocation5 + $0x64] ss:$16 sps:$4 sm:$0xff]  }
 0x259   :  { %1156 = vmatpush1.bf16.msra.mxu1 %v4784_v59 }
 0x25a   :  { %1157 = vmatprep.subr.bf16.mxu1 %v4787_v62 }
 0x25d   :  { %1158 = vmatpush1.bf16.msra.mxu1 %v4790_v49 }
 0x25e   :  { %1159 = vmatprep.subr.bf16.mxu1 %v4793_v58 }
 0x261   :  { %1160 = vmatpush1.bf16.msra.mxu1 %v4796_v35 }
 0x262   :  { %1161 = vmatprep.subr.bf16.mxu1 %v4799_v38 }
 0x265   :  { %1162 = vmatpush1.bf16.msra.mxu1 %v4802_v30 }
 0x266   :  { %1163 = vmatprep.subr.bf16.mxu1 %v4805_v52 }
 0x269   :  { %1164 = vmatpush1.bf16.msra.mxu1 %v4243_v19  ;;  %v3958_v19 = vld [vmem:[%s5404_s4 + $0x70] sm:$0xff]  }
 0x26a   :  { %1165 = vmatprep.subr.bf16.mxu1 %v4251_v21  ;;  %3344 = vmatpush3.bf16.msra.mxu0 %v3958_v19  ;;  %v3959_v21 = vld [vmem:[%s5404_s4 + $0x78] sm:$0xff]   ;;  %v4872_v19 = vld [vmem:[#allocation5 + $0x60] ss:$16 sps:$4 sm:$0xff]  }
 0x26b   :  { %3345 = vmatprep.subr.bf16.mxu0 %v5599_v33 }
 0x26d   :  { %1166 = vmatpush1.bf16.msra.mxu1 %v4257_v23  ;;  %v4830_v23 = vld [vmem:[#allocation5 + $0x4] ss:$16 sps:$4 sm:$0xff]  }
 0x26e   :  { %1167 = vmatprep.subr.bf16.mxu1 %v4263_v25  ;;  %3346 = vmatpush3.bf16.msra.mxu0 %v3959_v21  ;;  %5606 = vst [vmem:[#allocation25_spill] sm:$0xff] %v4830_v23  ;;  %v1104_v25 = vld [vmem:[#allocation2 + $0x10] sm:$0xff] }
 0x26f   :  { %1114 = vmatprep.subr.bf16.mxu0 %v4830_v23  ;;  %v4875_v21 = vld [vmem:[#allocation5 + $0x84] ss:$16 sps:$4 sm:$0xff]  }
 0x271   :  { %1168 = vmatpush1.bf16.msra.mxu1 %v4267_v27  ;;  %v2726_v27 = vcombine.high %v1104_v25, %v1104_v25 }
 0x272   :  { %1169 = vmatprep.subr.bf16.mxu1 %v4275_v29  ;;  %v4833_v29 = vcombine.low %v1104_v25, %v1104_v25  ;;  %v4878_v25 = vld [vmem:[#allocation5 + $0x80] ss:$16 sps:$4 sm:$0xff]  }
 0x273   :  { %2730 = vmatprep.mubr.msk.bf16.mxu1 %vm406_vm0, %v2726_v27 }
 0x275   :  { %1170 = vmatpush1.bf16.msra.mxu1 %v4281_v32 }
 0x276   :  { %1171 = vmatprep.subr.bf16.mxu1 %v4287_v34 }
 0x279   :  { %1172 = vmatpush1.bf16.msra.mxu1 %v4295_v37 }
 0x27a   :  { %1173 = vmatprep.subr.bf16.mxu1 %v4301_v39 }
 0x27d   :  { %1174 = vmatpush1.bf16.msra.mxu1 %v4307_v43 }
 0x27e   :  { %2729 = vmatprep.subr.msk.bf16.mxu1 %vm410_vm1, %v4313_v45 }
 0x281   :  { %1176 = vmatpush1.bf16.msra.mxu1 %v5566_v3 }
 0x282   :  { %3631 = vmatprep.subr.bf16.mxu1 %v5567_v4 }
 0x284   :  { %1188 = vmatmul.mubr.bf16.vlgmr.msra.gmra.mrb[16].mxu1 %v4833_v29 }
 0x285   :  { %3633 = vmatpush3.bf16.msra.mxu1 %v5569_v6 }
 0x286   :  { %3635 = vmatprep.subr.bf16.mxu1 %v5571_v8 }
 0x289   :  { %3637 = vmatpush3.bf16.msra.mxu1 %v5573_v10 }
 0x28a   :  { %3639 = vmatprep.subr.bf16.mxu1 %v5575_v12 }
 0x28d   :  { %3641 = vmatpush3.bf16.msra.mxu1 %v5577_v14 }
 0x28e   :  { %3643 = vmatprep.subr.bf16.mxu1 %v5579_v16 }
 0x291   :  { %3645 = vmatpush3.bf16.msra.mxu1 %v5581_v18 }
 0x292   :  { %3647 = vmatprep.subr.bf16.mxu1 %v5583_v22 }
 0x295   :  { %3649 = vmatpush3.bf16.msra.mxu1 %v5585_v26 }
 0x296   :  { %3651 = vmatprep.subr.bf16.mxu1 %v5587_v31  ;;  %v5612_v31 = vld [vmem:[#allocation43_spill] sm:$0xff] }
 0x299   :  { %3653 = vmatpush3.bf16.msra.mxu1 %v5589_v36  ;;  %v5611_v36 = vld [vmem:[#allocation41_spill] sm:$0xff] }
 0x29a   :  { %3655 = vmatprep.subr.bf16.mxu1 %v5591_v42  ;;  %v5610_v42 = vld [vmem:[#allocation39_spill] sm:$0xff] }
 0x29d   :  { %3657 = vmatpush3.bf16.msra.mxu1 %v5593_v57  ;;  %v5609_v57 = vld [vmem:[#allocation37_spill] sm:$0xff] }
 0x29e   :  { %3659 = vmatprep.subr.bf16.mxu1 %v5595_v48  ;;  %v4902_v48 = vld [vmem:[#allocation5 + $0x100] ss:$16 sps:$4 sm:$0xff]  }
 0x2a1   :  { %3661 = vmatpush3.bf16.msra.mxu1 %v5597_v53  ;;  %v4899_v53 = vld [vmem:[#allocation5 + $0x104] ss:$16 sps:$4 sm:$0xff]  }
 0x2a2   :  { %1461 = vmatprep.subr.bf16.mxu1 %v4830_v23  ;;  %v4896_v23 = vld [vmem:[#allocation5 + $0xe0] ss:$16 sps:$4 sm:$0xff]  }
 0x30b   :  { %v2950_v32 = vpop.f32.mrb[6].mxu0  ;;  %v2985_v34 = vpop.f32.mrb[6].mxu1 }
 0x30c   :  { %v2951_v37 = vpop.f32.mrb[7].mxu0  ;;  %v2986_v39 = vpop.f32.mrb[7].mxu1 }
 0x30d   :  { %v2952_v43 = vadd.f32 %v2951_v37, %v2950_v32  ;;  %v2987_v61 = vadd.f32 %v2986_v39, %v2985_v34  ;;  %v4884_v32 = vld [vmem:[#allocation5 + $0xa0] ss:$16 sps:$4 sm:$0xff]   ;;  %v4887_v34 = vld [vmem:[#allocation5 + $0xc4] ss:$16 sps:$4 sm:$0xff]  }
 0x30f   :  { %v908_v50 = vmax.f32 %v2952_v43, %v2987_v61  ;;  %v4890_v43 = vld [vmem:[#allocation5 + $0xc0] ss:$16 sps:$4 sm:$0xff]  }
 0x311   :  { %v909_v40 = vpack.c.bf16 %v908_v50, %v908_v50  ;;  %v4893_v50 = vld [vmem:[#allocation5 + $0xe4] ss:$16 sps:$4 sm:$0xff]  }
 0x313   :  { %3348 = vmatmul.mubr.bf16.vlgmr.msra.gmra.mrb[12].mxu0 %v909_v40 }
 0x314   :  { %1115 = vmatpush1.bf16.msra.mxu0 %v4853_v0  ;;  %2728 = vmatprep.mubr.msk.bf16.mxu0 %vm406_vm0, %v2726_v27  ;;  %v4881_v27 = vld [vmem:[#allocation5 + $0xa4] ss:$16 sps:$4 sm:$0xff]  }
 0x315   :  { %1116 = vmatprep.subr.bf16.mxu0 %v4857_v2 }
 0x318   :  { %1117 = vmatpush1.bf16.msra.mxu0 %v4860_v51 }
 0x319   :  { %1118 = vmatprep.subr.bf16.mxu0 %v4863_v60 }
 0x31c   :  { %1119 = vmatpush1.bf16.msra.mxu0 %v4866_v1 }
 0x31d   :  { %1120 = vmatprep.subr.bf16.mxu0 %v4869_v41 }
 0x320   :  { %1121 = vmatpush1.bf16.msra.mxu0 %v4872_v19 }
 0x321   :  { %1122 = vmatprep.subr.bf16.mxu0 %v4875_v21 }
 0x324   :  { %1123 = vmatpush1.bf16.msra.mxu0 %v4878_v25 }
 0x325   :  { %1124 = vmatprep.subr.bf16.mxu0 %v4881_v27 }
 0x328   :  { %1125 = vmatpush1.bf16.msra.mxu0 %v4884_v32 }
 0x329   :  { %1126 = vmatprep.subr.bf16.mxu0 %v4887_v34 }
 0x32b   :  { %v1097_v37 = vpop.f32.mrb[12].mxu1 }
 0x32c   :  { %v3369_v39 = vpop.f32.mrb[13].mxu1  ;;  %1127 = vmatpush1.bf16.msra.mxu0 %v4890_v43 }
 0x32d   :  { %v1100_v61 = vpop.f32.mrb[14].mxu1  ;;  %1128 = vmatprep.subr.bf16.mxu0 %v4893_v50  ;;  %v4905_v39 = vld [vmem:[#allocation5 + $0x124] ss:$16 sps:$4 sm:$0xff]  }
 0x32e   :  { %v3370_v40 = vpop.f32.mrb[15].mxu1  ;;  %v4908_v61 = vld [vmem:[#allocation5 + $0x120] ss:$16 sps:$4 sm:$0xff]  }
 0x32f   :  { %v5607_v40 = vld [vmem:[#allocation33_spill] sm:$0xff] }
 0x330   :  { %1129 = vmatpush1.bf16.msra.mxu0 %v4896_v23 }
 0x331   :  { %1130 = vmatprep.subr.bf16.mxu0 %v4899_v53 }
 0x334   :  { %1131 = vmatpush1.bf16.msra.mxu0 %v4902_v48 }
 0x335   :  { %1132 = vmatprep.subr.bf16.mxu0 %v4905_v39 }
 0x338   :  { %1133 = vmatpush1.bf16.msra.mxu0 %v4908_v61 }
 0x339   :  { %2727 = vmatprep.subr.msk.bf16.mxu0 %vm410_vm1, %v4309_v44 }
 0x33c   :  { %1135 = vmatpush1.bf16.msra.mxu0 %v4340_v54 }
 0x33d   :  { %3599 = vmatprep.subr.bf16.mxu0 %v5568_v5 }
 0x33f   :  { %1147 = vmatmul.mubr.bf16.vlgmr.msra.gmra.mrb[16].mxu0 %v4833_v29  ;;  %v5608_v29 = vld [vmem:[#allocation35_spill] sm:$0xff] }
 0x340   :  { %3601 = vmatpush3.bf16.msra.mxu0 %v5570_v7 }
 0x341   :  { %3603 = vmatprep.subr.bf16.mxu0 %v5572_v9 }
 0x344   :  { %3605 = vmatpush3.bf16.msra.mxu0 %v5574_v11 }
 0x345   :  { %3607 = vmatprep.subr.bf16.mxu0 %v5576_v13 }
 0x348   :  { %3609 = vmatpush3.bf16.msra.mxu0 %v5578_v15 }
 0x349   :  { %3611 = vmatprep.subr.bf16.mxu0 %v5580_v17 }
 0x34c   :  { %3613 = vmatpush3.bf16.msra.mxu0 %v5582_v20 }
 0x34d   :  { %3615 = vmatprep.subr.bf16.mxu0 %v5584_v24 }
 0x350   :  { %3617 = vmatpush3.bf16.msra.mxu0 %v5586_v28 }
 0x351   :  { %3619 = vmatprep.subr.bf16.mxu0 %v5607_v40 }
 0x354   :  { %3621 = vmatpush3.bf16.msra.mxu0 %v5608_v29 }
 0x355   :  { %3623 = vmatprep.subr.bf16.mxu0 %v5609_v57 }
 0x357   :  { %v1189_v26 = vpop.f32.mrb[16].mxu1 }
 0x358   :  { %3625 = vmatpush3.bf16.msra.mxu0 %v5610_v42  ;;  %v1191_v22 = vpop.f32.mrb[17].mxu1  ;;  %v1190_v4 = vadd.f32 %v1189_v26, %v4624_v46  ;;  %v3968_v26 = vld [vmem:[%s5404_s4 + $0xb0] sm:$0xff]  }
 0x359   :  { %3627 = vmatprep.subr.bf16.mxu0 %v5611_v36  ;;  %v1193_v18 = vpop.f32.mrb[18].mxu1  ;;  %v1192_v3 = vadd.f32 %v1191_v22, %v4628_v47  ;;  %v3967_v22 = vld [vmem:[%s5404_s4 + $0xa8] sm:$0xff]  }
 0x35a   :  { %v1194_v16 = vpop.f32.mrb[19].mxu1  ;;  %v1198_v52 = vmax.f32 %v1190_v4, 0.0  ;;  %v3965_v4 = vld [vmem:[%s5404_s4 + $0x98] sm:$0xff]  }
 0x35b   :  { %v1199_v35 = vmax.f32 %v1192_v3, 0.0  ;;  %v3964_v3 = vld [vmem:[%s5404_s4 + $0x90] sm:$0xff]  }
 0x35c   :  { %3629 = vmatpush3.bf16.msra.mxu0 %v5612_v31 }
 0x35d   :  { %3371 = vmatprep.subr.bf16.mxu0 %v5599_v33 }
 0x3e6   :  { %v1009_v14 = vpop.f32.mrb[12].mxu0 }
 0x3e7   :  { %v4932_v12 = vadd.f32 %v1097_v37, %v1009_v14  ;;  %v3349_v10 = vpop.f32.mrb[13].mxu0 }
 0x3e8   :  { %v1012_v8 = vpop.f32.mrb[14].mxu0 }
 0x3e9   :  { %v3350_v6 = vpop.f32.mrb[15].mxu0  ;;  %v3966_v8 = vld [vmem:[%s5404_s4 + $0xa0] sm:$0xff]  }
 0x3ea   :  { %v3962_v6 = vld [vmem:[%s5404_s4 + $0x80] sm:$0xff]  }
 0x412   :  { %v1148_v45 = vpop.f32.mrb[16].mxu0 }
 0x413   :  { %v1149_v30 = vadd.f32 %v1148_v45, %v4622_v55  ;;  %v1150_v38 = vpop.f32.mrb[17].mxu0  ;;  %v3963_v45 = vld [vmem:[%s5404_s4 + $0x88] sm:$0xff]  }
 0x414   :  { %v1151_v58 = vadd.f32 %v1150_v38, %v4626_v63  ;;  %v1152_v18 = vpop.f32.mrb[18].mxu0 }
 0x415   :  { %v1196_v16 = vmax.f32 %v1149_v30, 0.0  ;;  %v1153_v49 = vpop.f32.mrb[19].mxu0 }
 0x416   :  { %v1197_v14 = vmax.f32 %v1151_v58, 0.0  ;;  %v3969_v49 = vld [vmem:[%s5404_s4 + $0xb8] sm:$0xff]  }
 0x417   :  { %v1200_v37 = vmax.f32 %v1196_v16, %v1198_v52  ;;  %v1451_v58 = vld [vmem:[#allocation2 + $0x18] sm:$0xff] }
 0x418   :  { %v1201_v10 = vmax.f32 %v1197_v14, %v1199_v35  ;;  %v2756_v35 = vcombine.high %v1451_v58, %v1451_v58  ;;  %v2755_v38 = vcombine.low %v1451_v58, %v1451_v58  ;;  %v5024_v58 = vld [vmem:[#allocation5 + $0xac] ss:$16 sps:$4 sm:$0xff]  }
 0x419   :  { %5620 = vst [vmem:[#allocation29_spill] sm:$0xff] %v5024_v58 }
 0x41a   :  { %1266 = vmatprep.mubr.f32.mxu0 %v1201_v10  ;;  %1336 = vmatprep.mubr.f32.mxu1 %v1201_v10 }
 0x41b   :  { %1267 = vmatmul.mubr.f32.vlgmr.msra.gmra.mrb[20].mxu0 %v1200_v37  ;;  %1337 = vmatmul.mubr.f32.vlgmr.msra.gmra.mrb[20].mxu1 %v1200_v37 }
 0x41c   :  { %3372 = vmatpush3.bf16.msra.mxu0 %v3962_v6  ;;  %1462 = vmatpush1.bf16.msra.mxu1 %v4853_v0 }
 0x41d   :  { %3373 = vmatprep.subr.bf16.mxu0 %v5599_v33  ;;  %3387 = vmatprep.mubr.msk.bf16.mxu0 %vm4119_vm2, %v5599_v33 }
 0x41e   :  { %1463 = vmatprep.subr.bf16.mxu1 %v4857_v2  ;;  %2758 = vmatprep.mubr.msk.bf16.mxu1 %vm406_vm0, %v2756_v35 }
 0x420   :  { %3374 = vmatpush3.bf16.msra.mxu0 %v3963_v45  ;;  %1464 = vmatpush1.bf16.msra.mxu1 %v4860_v51  ;;  %v5613_v45 = vld [vmem:[#allocation13_spill] sm:$0xff] }
 0x421   :  { %3375 = vmatprep.subr.bf16.mxu0 %v5599_v33  ;;  %1465 = vmatprep.subr.bf16.mxu1 %v4863_v60 }
 0x424   :  { %3376 = vmatpush3.bf16.msra.mxu0 %v3964_v3  ;;  %1466 = vmatpush1.bf16.msra.mxu1 %v4866_v1  ;;  %v5614_v3 = vld [vmem:[#allocation15_spill] sm:$0xff] }
 0x425   :  { %3377 = vmatprep.subr.bf16.mxu0 %v5599_v33  ;;  %1467 = vmatprep.subr.bf16.mxu1 %v4869_v41 }
 0x428   :  { %3378 = vmatpush3.bf16.msra.mxu0 %v3965_v4  ;;  %1468 = vmatpush1.bf16.msra.mxu1 %v4872_v19  ;;  %v5615_v4 = vld [vmem:[#allocation17_spill] sm:$0xff] }
 0x429   :  { %3379 = vmatprep.subr.bf16.mxu0 %v5599_v33  ;;  %1469 = vmatprep.subr.bf16.mxu1 %v4875_v21 }
 0x42c   :  { %3380 = vmatpush3.bf16.msra.mxu0 %v3966_v8  ;;  %1470 = vmatpush1.bf16.msra.mxu1 %v4878_v25  ;;  %v5616_v8 = vld [vmem:[#allocation19_spill] sm:$0xff] }
 0x42d   :  { %3381 = vmatprep.subr.bf16.mxu0 %v5599_v33  ;;  %1471 = vmatprep.subr.bf16.mxu1 %v4881_v27 }
 0x430   :  { %3382 = vmatpush3.bf16.msra.mxu0 %v3967_v22  ;;  %1472 = vmatpush1.bf16.msra.mxu1 %v4884_v32  ;;  %v5617_v22 = vld [vmem:[#allocation21_spill] sm:$0xff] }
 0x431   :  { %3383 = vmatprep.subr.bf16.mxu0 %v5599_v33  ;;  %1473 = vmatprep.subr.bf16.mxu1 %v4887_v34 }
 0x434   :  { %1474 = vmatpush1.bf16.msra.mxu1 %v4890_v43  ;;  %3384 = vmatpush3.bf16.msra.mxu0 %v3968_v26  ;;  %v5618_v26 = vld [vmem:[#allocation23_spill] sm:$0xff] }
 0x435   :  { %1475 = vmatprep.subr.bf16.mxu1 %v4893_v50  ;;  %3385 = vmatprep.subr.bf16.mxu0 %v5599_v33 }
 0x438   :  { %1476 = vmatpush1.bf16.msra.mxu1 %v4896_v23  ;;  %3386 = vmatpush3.bf16.msra.mxu0 %v3969_v49  ;;  %v5021_v49 = vld [vmem:[#allocation5 + $0x88] ss:$16 sps:$4 sm:$0xff]  }
 0x439   :  { %1477 = vmatprep.subr.bf16.mxu1 %v4899_v53  ;;  %1502 = vmatprep.subr.bf16.mxu0 %v4781_v56  ;;  %5619 = vst [vmem:[#allocation27_spill] sm:$0xff] %v5021_v49 }
 0x43c   :  { %1478 = vmatpush1.bf16.msra.mxu1 %v4902_v48 }
 0x43d   :  { %1479 = vmatprep.subr.bf16.mxu1 %v4905_v39 }
 0x440   :  { %1480 = vmatpush1.bf16.msra.mxu1 %v4908_v61 }
 0x441   :  { %2757 = vmatprep.subr.msk.bf16.mxu1 %vm410_vm1, %v4309_v44 }
 0x444   :  { %1482 = vmatpush1.bf16.msra.mxu1 %v4340_v54 }
 0x445   :  { %3663 = vmatprep.subr.bf16.mxu1 %v5568_v5 }
 0x447   :  { %1494 = vmatmul.mubr.bf16.vlgmr.msra.gmra.mrb[24].mxu1 %v2755_v38 }
 0x448   :  { %3665 = vmatpush3.bf16.msra.mxu1 %v5570_v7 }
 0x449   :  { %3667 = vmatprep.subr.bf16.mxu1 %v5572_v9 }
 0x44c   :  { %3669 = vmatpush3.bf16.msra.mxu1 %v5574_v11 }
 0x44d   :  { %3671 = vmatprep.subr.bf16.mxu1 %v5576_v13 }
 0x450   :  { %3673 = vmatpush3.bf16.msra.mxu1 %v5578_v15 }
 0x451   :  { %3675 = vmatprep.subr.bf16.mxu1 %v5580_v17 }
 0x454   :  { %3677 = vmatpush3.bf16.msra.mxu1 %v5582_v20 }
 0x455   :  { %3679 = vmatprep.subr.bf16.mxu1 %v5584_v24 }
 0x458   :  { %3681 = vmatpush3.bf16.msra.mxu1 %v5586_v28 }
 0x459   :  { %3683 = vmatprep.subr.bf16.mxu1 %v5607_v40 }
 0x45c   :  { %3685 = vmatpush3.bf16.msra.mxu1 %v5608_v29 }
 0x45d   :  { %3687 = vmatprep.subr.bf16.mxu1 %v5609_v57 }
 0x460   :  { %3689 = vmatpush3.bf16.msra.mxu1 %v5610_v42 }
 0x461   :  { %3691 = vmatprep.subr.bf16.mxu1 %v5611_v36 }
 0x464   :  { %3693 = vmatpush3.bf16.msra.mxu1 %v5612_v31 }
 0x465   :  { %3391 = vmatprep.subr.bf16.mxu1 %v5599_v33 }
 0x4ee   :  { %v3038_v30 = vpop.f32.mrb[20].mxu0  ;;  %v3073_v52 = vpop.f32.mrb[20].mxu1 }
 0x4ef   :  { %v3039_v18 = vpop.f32.mrb[21].mxu0  ;;  %v3074_v16 = vpop.f32.mrb[21].mxu1 }
 0x4f0   :  { %v3040_v14 = vadd.f32 %v3039_v18, %v3038_v30  ;;  %v3075_v37 = vadd.f32 %v3074_v16, %v3073_v52  ;;  %v5030_v30 = vld [vmem:[#allocation5 + $0xcc] ss:$16 sps:$4 sm:$0xff]   ;;  %v5033_v52 = vld [vmem:[#allocation5 + $0xc8] ss:$16 sps:$4 sm:$0xff]  }
 0x4f1   :  { %5622 = vst [vmem:[#allocation33_spill] sm:$0xff] %v5030_v30  ;;  %5623 = vst [vmem:[#allocation35_spill] sm:$0xff] %v5033_v52  ;;  %v5036_v18 = vld [vmem:[#allocation5 + $0xec] ss:$16 sps:$4 sm:$0xff]   ;;  %v5039_v16 = vld [vmem:[#allocation5 + $0xe8] ss:$16 sps:$4 sm:$0xff]  }
 0x4f2   :  { %v1342_v10 = vmax.f32 %v3040_v14, %v3075_v37  ;;  %5624 = vst [vmem:[#allocation37_spill] sm:$0xff] %v5036_v18  ;;  %5625 = vst [vmem:[#allocation39_spill] sm:$0xff] %v5039_v16  ;;  %v5042_v14 = vld [vmem:[#allocation5 + $0x10c] ss:$16 sps:$4 sm:$0xff]   ;;  %v5045_v37 = vld [vmem:[#allocation5 + $0x108] ss:$16 sps:$4 sm:$0xff]  }
 0x4f3   :  { %5626 = vst [vmem:[#allocation41_spill] sm:$0xff] %v5042_v14  ;;  %5627 = vst [vmem:[#allocation43_spill] sm:$0xff] %v5045_v37 }
 0x4f4   :  { %v1343_v6 = vpack.c.bf16 %v1342_v10, %v1342_v10  ;;  %v5048_v10 = vld [vmem:[#allocation5 + $0x12c] ss:$16 sps:$4 sm:$0xff]  }
 0x4f5   :  { %5628 = vst [vmem:[#allocation45_spill] sm:$0xff] %v5048_v10 }
 0x4f6   :  { %3388 = vmatmul.mubr.bf16.vlgmr.msra.gmra.mrb[24].mxu0 %v1343_v6  ;;  %v5051_v6 = vld [vmem:[#allocation5 + $0x128] ss:$16 sps:$4 sm:$0xff]  }
 0x4f7   :  { %1503 = vmatpush1.bf16.msra.mxu0 %v4784_v59  ;;  %2760 = vmatprep.mubr.msk.bf16.mxu0 %vm406_vm0, %v2756_v35  ;;  %v5027_v35 = vld [vmem:[#allocation5 + $0xa8] ss:$16 sps:$4 sm:$0xff]   ;;  %5629 = vst [vmem:[#allocation46_spill] sm:$0xff] %v5051_v6 }
 0x4f8   :  { %1504 = vmatprep.subr.bf16.mxu0 %v4787_v62  ;;  %5621 = vst [vmem:[#allocation31_spill] sm:$0xff] %v5027_v35 }
 0x4fb   :  { %1505 = vmatpush1.bf16.msra.mxu0 %v5613_v45 }
 0x4fc   :  { %1506 = vmatprep.subr.bf16.mxu0 %v5614_v3 }
 0x4ff   :  { %1507 = vmatpush1.bf16.msra.mxu0 %v5615_v4 }
 0x500   :  { %1508 = vmatprep.subr.bf16.mxu0 %v5616_v8 }
 0x503   :  { %1509 = vmatpush1.bf16.msra.mxu0 %v5617_v22 }
 0x504   :  { %1510 = vmatprep.subr.bf16.mxu0 %v5618_v26 }
 0x507   :  { %1511 = vmatpush1.bf16.msra.mxu0 %v5021_v49 }
 0x508   :  { %1512 = vmatprep.subr.bf16.mxu0 %v5024_v58  ;;  %v5638_v58 = vld [vmem:[#allocation26_spill] sm:$0xff] }
 0x50b   :  { %1513 = vmatpush1.bf16.msra.mxu0 %v5027_v35  ;;  %v5636_v35 = vld [vmem:[#allocation22_spill] sm:$0xff] }
 0x50c   :  { %1514 = vmatprep.subr.bf16.mxu0 %v5030_v30  ;;  %v5634_v30 = vld [vmem:[#allocation18_spill] sm:$0xff] }
 0x50f   :  { %1515 = vmatpush1.bf16.msra.mxu0 %v5033_v52  ;;  %v5632_v52 = vld [vmem:[#allocation14_spill] sm:$0xff] }
 0x510   :  { %1516 = vmatprep.subr.bf16.mxu0 %v5036_v18  ;;  %v5630_v18 = vld [vmem:[#allocation11_spill] sm:$0xff] }
 0x513   :  { %1517 = vmatpush1.bf16.msra.mxu0 %v5039_v16  ;;  %v5631_v16 = vld [vmem:[#allocation12_spill] sm:$0xff] }
 0x514   :  { %1518 = vmatprep.subr.bf16.mxu0 %v5042_v14  ;;  %v5633_v14 = vld [vmem:[#allocation16_spill] sm:$0xff] }
 0x517   :  { %1519 = vmatpush1.bf16.msra.mxu0 %v5045_v37  ;;  %v5635_v37 = vld [vmem:[#allocation20_spill] sm:$0xff] }
 0x518   :  { %1520 = vmatprep.subr.bf16.mxu0 %v5048_v10  ;;  %v5637_v10 = vld [vmem:[#allocation24_spill] sm:$0xff] }
 0x51b   :  { %1521 = vmatpush1.bf16.msra.mxu0 %v5051_v6  ;;  %v5639_v6 = vld [vmem:[#allocation28_spill] sm:$0xff] }
 0x51c   :  { %2759 = vmatprep.subr.msk.bf16.mxu0 %vm410_vm1, %v5630_v18  ;;  %v5640_v18 = vld [vmem:[#allocation30_spill] sm:$0xff] }
 0x51f   :  { %1523 = vmatpush1.bf16.msra.mxu0 %v5631_v16  ;;  %v5641_v16 = vld [vmem:[#allocation32_spill] sm:$0xff] }
 0x520   :  { %3695 = vmatprep.subr.bf16.mxu0 %v5632_v52  ;;  %v5642_v52 = vld [vmem:[#allocation34_spill] sm:$0xff] }
 0x522   :  { %1535 = vmatmul.mubr.bf16.vlgmr.msra.gmra.mrb[28].mxu0 %v2755_v38  ;;  %v5643_v38 = vld [vmem:[#allocation36_spill] sm:$0xff] }
 0x523   :  { %3697 = vmatpush3.bf16.msra.mxu0 %v5633_v14  ;;  %v5644_v14 = vld [vmem:[#allocation38_spill] sm:$0xff] }
 0x524   :  { %3699 = vmatprep.subr.bf16.mxu0 %v5634_v30  ;;  %v5645_v30 = vld [vmem:[#allocation40_spill] sm:$0xff] }
 0x527   :  { %3701 = vmatpush3.bf16.msra.mxu0 %v5635_v37  ;;  %v5646_v37 = vld [vmem:[#allocation42_spill] sm:$0xff] }
 0x528   :  { %3703 = vmatprep.subr.bf16.mxu0 %v5636_v35  ;;  %v5647_v35 = vld [vmem:[#allocation44_spill] sm:$0xff] }
 0x52b   :  { %3705 = vmatpush3.bf16.msra.mxu0 %v5637_v10  ;;  %v5648_v10 = vld [vmem:[#allocation25_spill] sm:$0xff] }
 0x52c   :  { %3707 = vmatprep.subr.bf16.mxu0 %v5638_v58  ;;  %v1495_v58 = vpop.f32.mrb[24].mxu1 }
 0x52f   :  { %3709 = vmatpush3.bf16.msra.mxu0 %v5639_v6  ;;  %v1497_v6 = vpop.f32.mrb[25].mxu1 }
 0x530   :  { %3711 = vmatprep.subr.bf16.mxu0 %v5640_v18  ;;  %v1499_v49 = vpop.f32.mrb[26].mxu1 }
 0x531   :  { %v1500_v18 = vpop.f32.mrb[27].mxu1 }
 0x533   :  { %3713 = vmatpush3.bf16.msra.mxu0 %v5641_v16 }
 0x534   :  { %3715 = vmatprep.subr.bf16.mxu0 %v5642_v52 }
 0x537   :  { %3717 = vmatpush3.bf16.msra.mxu0 %v5643_v38 }
 0x538   :  { %3719 = vmatprep.subr.bf16.mxu0 %v5644_v14  ;;  %v1496_v14 = vadd.f32 %v1495_v58, %v4622_v55  ;;  %v3973_v58 = vld [vmem:[%s5404_s4 + $0xc8] sm:$0xff]  }
 0x53a   :  { %v1543_v8 = vmax.f32 %v1496_v14, 0.0  ;;  %v1798_v14 = vld [vmem:[#allocation2 + $0x20] sm:$0xff] }
 0x53b   :  { %3721 = vmatpush3.bf16.msra.mxu0 %v5645_v30  ;;  %v1498_v30 = vadd.f32 %v1497_v6, %v4626_v63 }
 0x53c   :  { %3723 = vmatprep.subr.bf16.mxu0 %v5646_v37 }
 0x53d   :  { %v1544_v4 = vmax.f32 %v1498_v30, 0.0  ;;  %v3979_v30 = vld [vmem:[%s5404_s4 + $0xf8] sm:$0xff]  }
 0x53f   :  { %3725 = vmatpush3.bf16.msra.mxu0 %v5647_v35 }
 0x540   :  { %1808 = vmatprep.subr.bf16.mxu0 %v5648_v10 }
 0x5c9   :  { %v1443_v26 = vpop.f32.mrb[24].mxu0 }
 0x5ca   :  { %v5075_v16 = vadd.f32 %v1443_v26, %v4932_v12  ;;  %v3389_v52 = vpop.f32.mrb[25].mxu0 }
 0x5cb   :  { %v1446_v38 = vpop.f32.mrb[26].mxu0 }
 0x5cc   :  { %v3390_v22 = vpop.f32.mrb[27].mxu0 }
 0x5cd   :  { %v3972_v22 = vld [vmem:[%s5404_s4 + $0xc0] sm:$0xff]  }
 0x5f5   :  { %v1536_v37 = vpop.f32.mrb[28].mxu0 }
 0x5f6   :  { %v1537_v35 = vadd.f32 %v1536_v37, %v4624_v46  ;;  %v1538_v10 = vpop.f32.mrb[29].mxu0  ;;  %v2786_v37 = vcombine.high %v1798_v14, %v1798_v14 }
 0x5f7   :  { %v1539_v49 = vadd.f32 %v1538_v10, %v4628_v47  ;;  %v1540_v18 = vpop.f32.mrb[30].mxu0  ;;  %v2785_v10 = vcombine.low %v1798_v14, %v1798_v14  ;;  %v5656_v14 = vld [vmem:[#allocation29_spill] sm:$0xff] }
 0x5f8   :  { %v1545_v3 = vmax.f32 %v1537_v35, 0.0  ;;  %v1541_v45 = vpop.f32.mrb[31].mxu0  ;;  %v3978_v35 = vld [vmem:[%s5404_s4 + $0xf0] sm:$0xff]  }
 0x5f9   :  { %v1546_v12 = vmax.f32 %v1539_v49, 0.0  ;;  %v3974_v45 = vld [vmem:[%s5404_s4 + $0xd0] sm:$0xff]  }
 0x5fa   :  { %v1547_v26 = vmax.f32 %v1543_v8, %v1545_v3  ;;  %v3975_v3 = vld [vmem:[%s5404_s4 + $0xd8] sm:$0xff]   ;;  %v3977_v8 = vld [vmem:[%s5404_s4 + $0xe8] sm:$0xff]  }
 0x5fb   :  { %v1548_v52 = vmax.f32 %v1544_v4, %v1546_v12  ;;  %v3976_v4 = vld [vmem:[%s5404_s4 + $0xe0] sm:$0xff]  }
 0x5fd   :  { %1613 = vmatprep.mubr.f32.mxu1 %v1548_v52  ;;  %1683 = vmatprep.mubr.f32.mxu0 %v1548_v52 }
 0x5fe   :  { %1614 = vmatmul.mubr.f32.vlgmr.msra.gmra.mrb[22].mxu1 %v1547_v26  ;;  %1684 = vmatmul.mubr.f32.vlgmr.msra.gmra.mrb[22].mxu0 %v1547_v26 }
 0x5ff   :  { %3392 = vmatpush3.bf16.msra.mxu1 %v3972_v22  ;;  %1809 = vmatpush1.bf16.msra.mxu0 %v4853_v0 }
 0x600   :  { %3393 = vmatprep.subr.bf16.mxu1 %v5599_v33  ;;  %3407 = vmatprep.mubr.msk.bf16.mxu1 %vm4119_vm2, %v5599_v33 }
 0x601   :  { %1810 = vmatprep.subr.bf16.mxu0 %v4857_v2  ;;  %2788 = vmatprep.mubr.msk.bf16.mxu0 %vm406_vm0, %v2786_v37 }
 0x603   :  { %3394 = vmatpush3.bf16.msra.mxu1 %v3973_v58  ;;  %1811 = vmatpush1.bf16.msra.mxu0 %v4860_v51  ;;  %v5649_v58 = vld [vmem:[#allocation13_spill] sm:$0xff] }
 0x604   :  { %3395 = vmatprep.subr.bf16.mxu1 %v5599_v33  ;;  %1812 = vmatprep.subr.bf16.mxu0 %v4863_v60 }
 0x607   :  { %3396 = vmatpush3.bf16.msra.mxu1 %v3974_v45  ;;  %1813 = vmatpush1.bf16.msra.mxu0 %v4866_v1  ;;  %v5650_v45 = vld [vmem:[#allocation15_spill] sm:$0xff] }
 0x608   :  { %3397 = vmatprep.subr.bf16.mxu1 %v5599_v33  ;;  %1814 = vmatprep.subr.bf16.mxu0 %v4869_v41 }
 0x60b   :  { %3398 = vmatpush3.bf16.msra.mxu1 %v3975_v3  ;;  %1815 = vmatpush1.bf16.msra.mxu0 %v4872_v19  ;;  %v5651_v3 = vld [vmem:[#allocation17_spill] sm:$0xff] }
 0x60c   :  { %3399 = vmatprep.subr.bf16.mxu1 %v5599_v33  ;;  %1816 = vmatprep.subr.bf16.mxu0 %v4875_v21 }
 0x60f   :  { %3400 = vmatpush3.bf16.msra.mxu1 %v3976_v4  ;;  %1817 = vmatpush1.bf16.msra.mxu0 %v4878_v25  ;;  %v5652_v4 = vld [vmem:[#allocation19_spill] sm:$0xff] }
 0x610   :  { %3401 = vmatprep.subr.bf16.mxu1 %v5599_v33  ;;  %1818 = vmatprep.subr.bf16.mxu0 %v4881_v27 }
 0x613   :  { %3402 = vmatpush3.bf16.msra.mxu1 %v3977_v8  ;;  %1819 = vmatpush1.bf16.msra.mxu0 %v4884_v32  ;;  %v5653_v8 = vld [vmem:[#allocation21_spill] sm:$0xff] }
 0x614   :  { %3403 = vmatprep.subr.bf16.mxu1 %v5599_v33  ;;  %1820 = vmatprep.subr.bf16.mxu0 %v4887_v34 }
 0x617   :  { %1821 = vmatpush1.bf16.msra.mxu0 %v4890_v43  ;;  %3404 = vmatpush3.bf16.msra.mxu1 %v3978_v35  ;;  %v5654_v35 = vld [vmem:[#allocation23_spill] sm:$0xff] }
 0x618   :  { %1822 = vmatprep.subr.bf16.mxu0 %v4893_v50  ;;  %3405 = vmatprep.subr.bf16.mxu1 %v5599_v33 }
 0x61b   :  { %1823 = vmatpush1.bf16.msra.mxu0 %v4896_v23  ;;  %3406 = vmatpush3.bf16.msra.mxu1 %v3979_v30  ;;  %v5655_v30 = vld [vmem:[#allocation27_spill] sm:$0xff] }
 0x61c   :  { %1824 = vmatprep.subr.bf16.mxu0 %v4899_v53  ;;  %1849 = vmatprep.subr.bf16.mxu1 %v4781_v56 }
 0x61f   :  { %1825 = vmatpush1.bf16.msra.mxu0 %v4902_v48 }
 0x620   :  { %1826 = vmatprep.subr.bf16.mxu0 %v4905_v39 }
 0x623   :  { %1827 = vmatpush1.bf16.msra.mxu0 %v4908_v61 }
 0x624   :  { %2787 = vmatprep.subr.msk.bf16.mxu0 %vm410_vm1, %v4309_v44 }
 0x627   :  { %1829 = vmatpush1.bf16.msra.mxu0 %v4340_v54 }
 0x628   :  { %3727 = vmatprep.subr.bf16.mxu0 %v5568_v5 }
 0x62a   :  { %1841 = vmatmul.mubr.bf16.vlgmr.msra.gmra.mrb[32].mxu0 %v2785_v10 }
 0x62b   :  { %3729 = vmatpush3.bf16.msra.mxu0 %v5570_v7 }
 0x62c   :  { %3731 = vmatprep.subr.bf16.mxu0 %v5572_v9 }
 0x62f   :  { %3733 = vmatpush3.bf16.msra.mxu0 %v5574_v11 }
 0x630   :  { %3735 = vmatprep.subr.bf16.mxu0 %v5576_v13 }
 0x633   :  { %3737 = vmatpush3.bf16.msra.mxu0 %v5578_v15 }
 0x634   :  { %3739 = vmatprep.subr.bf16.mxu0 %v5580_v17 }
 0x637   :  { %3741 = vmatpush3.bf16.msra.mxu0 %v5582_v20 }
 0x638   :  { %3743 = vmatprep.subr.bf16.mxu0 %v5584_v24 }
 0x63b   :  { %3745 = vmatpush3.bf16.msra.mxu0 %v5586_v28 }
 0x63c   :  { %3747 = vmatprep.subr.bf16.mxu0 %v5607_v40 }
 0x63f   :  { %3749 = vmatpush3.bf16.msra.mxu0 %v5608_v29 }
 0x640   :  { %3751 = vmatprep.subr.bf16.mxu0 %v5609_v57 }
 0x643   :  { %3753 = vmatpush3.bf16.msra.mxu0 %v5610_v42 }
 0x644   :  { %3755 = vmatprep.subr.bf16.mxu0 %v5611_v36 }
 0x647   :  { %3757 = vmatpush3.bf16.msra.mxu0 %v5612_v31 }
 0x648   :  { %3411 = vmatprep.subr.bf16.mxu0 %v5599_v33 }
 0x6d1   :  { %v3117_v6 = vpop.f32.mrb[22].mxu1  ;;  %v3152_v38 = vpop.f32.mrb[22].mxu0 }
 0x6d2   :  { %v3118_v49 = vpop.f32.mrb[23].mxu1  ;;  %v3153_v18 = vpop.f32.mrb[23].mxu0 }
 0x6d3   :  { %v3119_v12 = vadd.f32 %v3118_v49, %v3117_v6  ;;  %v3154_v26 = vadd.f32 %v3153_v18, %v3152_v38  ;;  %v5657_v6 = vld [vmem:[#allocation31_spill] sm:$0xff]  ;;  %v5660_v49 = vld [vmem:[#allocation37_spill] sm:$0xff] }
 0x6d4   :  { %v5659_v38 = vld [vmem:[#allocation35_spill] sm:$0xff] }
 0x6d5   :  { %v1689_v52 = vmax.f32 %v3119_v12, %v3154_v26  ;;  %v5661_v18 = vld [vmem:[#allocation39_spill] sm:$0xff]  ;;  %v5662_v12 = vld [vmem:[#allocation41_spill] sm:$0xff] }
 0x6d6   :  { %v5663_v26 = vld [vmem:[#allocation43_spill] sm:$0xff] }
 0x6d7   :  { %v1690_v22 = vpack.c.bf16 %v1689_v52, %v1689_v52  ;;  %v5664_v52 = vld [vmem:[#allocation45_spill] sm:$0xff] }
 0x6d9   :  { %3408 = vmatmul.mubr.bf16.vlgmr.msra.gmra.mrb[28].mxu1 %v1690_v22  ;;  %v5665_v22 = vld [vmem:[#allocation46_spill] sm:$0xff] }
 0x6da   :  { %1850 = vmatpush1.bf16.msra.mxu1 %v4784_v59  ;;  %2790 = vmatprep.mubr.msk.bf16.mxu1 %vm406_vm0, %v2786_v37  ;;  %v5658_v37 = vld [vmem:[#allocation33_spill] sm:$0xff] }
 0x6db   :  { %1851 = vmatprep.subr.bf16.mxu1 %v4787_v62 }
 0x6de   :  { %1852 = vmatpush1.bf16.msra.mxu1 %v5649_v58 }
 0x6df   :  { %1853 = vmatprep.subr.bf16.mxu1 %v5650_v45 }
 0x6e2   :  { %1854 = vmatpush1.bf16.msra.mxu1 %v5651_v3 }
 0x6e3   :  { %1855 = vmatprep.subr.bf16.mxu1 %v5652_v4 }
 0x6e6   :  { %1856 = vmatpush1.bf16.msra.mxu1 %v5653_v8 }
 0x6e7   :  { %1857 = vmatprep.subr.bf16.mxu1 %v5654_v35 }
 0x6ea   :  { %1858 = vmatpush1.bf16.msra.mxu1 %v5655_v30  ;;  %v5666_v30 = vld [vmem:[#allocation11_spill] sm:$0xff] }
 0x6eb   :  { %1859 = vmatprep.subr.bf16.mxu1 %v5656_v14 }
 0x6ee   :  { %1860 = vmatpush1.bf16.msra.mxu1 %v5657_v6  ;;  %v5667_v6 = vld [vmem:[#allocation12_spill] sm:$0xff] }
 0x6ef   :  { %1861 = vmatprep.subr.bf16.mxu1 %v5658_v37  ;;  %v5668_v37 = vld [vmem:[#allocation14_spill] sm:$0xff] }
 0x6f2   :  { %1862 = vmatpush1.bf16.msra.mxu1 %v5659_v38  ;;  %v5669_v38 = vld [vmem:[#allocation16_spill] sm:$0xff] }
 0x6f3   :  { %1863 = vmatprep.subr.bf16.mxu1 %v5660_v49  ;;  %v5670_v49 = vld [vmem:[#allocation18_spill] sm:$0xff] }
 0x6f6   :  { %1864 = vmatpush1.bf16.msra.mxu1 %v5661_v18  ;;  %v5671_v18 = vld [vmem:[#allocation20_spill] sm:$0xff] }
 0x6f7   :  { %1865 = vmatprep.subr.bf16.mxu1 %v5662_v12  ;;  %v5672_v12 = vld [vmem:[#allocation22_spill] sm:$0xff] }
 0x6fa   :  { %1866 = vmatpush1.bf16.msra.mxu1 %v5663_v26  ;;  %v5673_v26 = vld [vmem:[#allocation24_spill] sm:$0xff] }
 0x6fb   :  { %1867 = vmatprep.subr.bf16.mxu1 %v5664_v52  ;;  %v5674_v52 = vld [vmem:[#allocation26_spill] sm:$0xff] }
 0x6fe   :  { %1868 = vmatpush1.bf16.msra.mxu1 %v5665_v22  ;;  %v5675_v22 = vld [vmem:[#allocation28_spill] sm:$0xff] }
 0x6ff   :  { %2789 = vmatprep.subr.msk.bf16.mxu1 %vm410_vm1, %v5666_v30  ;;  %v5676_v30 = vld [vmem:[#allocation30_spill] sm:$0xff] }
 0x702   :  { %1870 = vmatpush1.bf16.msra.mxu1 %v5667_v6  ;;  %v5677_v6 = vld [vmem:[#allocation32_spill] sm:$0xff] }
 0x703   :  { %3759 = vmatprep.subr.bf16.mxu1 %v5668_v37  ;;  %v5678_v37 = vld [vmem:[#allocation34_spill] sm:$0xff] }
 0x705   :  { %1882 = vmatmul.mubr.bf16.vlgmr.msra.gmra.mrb[32].mxu1 %v2785_v10  ;;  %v5679_v10 = vld [vmem:[#allocation36_spill] sm:$0xff] }
 0x706   :  { %3761 = vmatpush3.bf16.msra.mxu1 %v5669_v38  ;;  %v5680_v38 = vld [vmem:[#allocation38_spill] sm:$0xff] }
 0x707   :  { %3763 = vmatprep.subr.bf16.mxu1 %v5670_v49  ;;  %v5681_v49 = vld [vmem:[#allocation40_spill] sm:$0xff] }
 0x70a   :  { %3765 = vmatpush3.bf16.msra.mxu1 %v5671_v18  ;;  %v5682_v18 = vld [vmem:[#allocation42_spill] sm:$0xff] }
 0x70b   :  { %3767 = vmatprep.subr.bf16.mxu1 %v5672_v12  ;;  %v5683_v12 = vld [vmem:[#allocation44_spill] sm:$0xff] }
 0x70e   :  { %3769 = vmatpush3.bf16.msra.mxu1 %v5673_v26  ;;  %v5684_v26 = vld [vmem:[#allocation25_spill] sm:$0xff] }
 0x70f   :  { %3771 = vmatprep.subr.bf16.mxu1 %v5674_v52  ;;  %v1842_v52 = vpop.f32.mrb[32].mxu0 }
 0x712   :  { %3773 = vmatpush3.bf16.msra.mxu1 %v5675_v22  ;;  %v1844_v22 = vpop.f32.mrb[33].mxu0 }
 0x713   :  { %3775 = vmatprep.subr.bf16.mxu1 %v5676_v30  ;;  %v1846_v14 = vpop.f32.mrb[34].mxu0 }
 0x714   :  { %v1847_v30 = vpop.f32.mrb[35].mxu0 }
 0x716   :  { %3777 = vmatpush3.bf16.msra.mxu1 %v5677_v6 }
 0x717   :  { %3779 = vmatprep.subr.bf16.mxu1 %v5678_v37 }
 0x71a   :  { %3781 = vmatpush3.bf16.msra.mxu1 %v5679_v10 }
 0x71b   :  { %3783 = vmatprep.subr.bf16.mxu1 %v5680_v38  ;;  %v1843_v38 = vadd.f32 %v1842_v52, %v4622_v55  ;;  %v5715_v52 = vld [vmem:[#allocation36_spill] sm:$0xff] }
 0x71d   :  { %v1890_v4 = vmax.f32 %v1843_v38, 0.0  ;;  %v3983_v38 = vld [vmem:[%s5404_s4 + $0x108] sm:$0xff]  }
 0x71e   :  { %3785 = vmatpush3.bf16.msra.mxu1 %v5681_v49  ;;  %v1845_v49 = vadd.f32 %v1844_v22, %v4626_v63  ;;  %v5716_v22 = vld [vmem:[#allocation38_spill] sm:$0xff] }
 0x71f   :  { %3787 = vmatprep.subr.bf16.mxu1 %v5682_v18 }
 0x720   :  { %v1891_v3 = vmax.f32 %v1845_v49, 0.0  ;;  %v5712_v49 = vld [vmem:[#allocation30_spill] sm:$0xff] }
 0x722   :  { %3789 = vmatpush3.bf16.msra.mxu1 %v5683_v12 }
 0x723   :  { %2155 = vmatprep.subr.bf16.mxu1 %v5684_v26 }
 0x7ac   :  { %v1790_v35 = vpop.f32.mrb[28].mxu1 }
 0x7ad   :  { %v5196_v6 = vadd.f32 %v1790_v35, %v5075_v16  ;;  %v3409_v37 = vpop.f32.mrb[29].mxu1 }
 0x7ae   :  { %v1793_v10 = vpop.f32.mrb[30].mxu1 }
 0x7af   :  { %v3410_v8 = vpop.f32.mrb[31].mxu1  ;;  %v5717_v10 = vld [vmem:[#allocation40_spill] sm:$0xff] }
 0x7b0   :  { %v3982_v8 = vld [vmem:[%s5404_s4 + $0x100] sm:$0xff]  }
 0x7d8   :  { %v1883_v18 = vpop.f32.mrb[32].mxu1 }
 0x7d9   :  { %v1884_v12 = vadd.f32 %v1883_v18, %v4624_v46  ;;  %v1885_v26 = vpop.f32.mrb[33].mxu1  ;;  %v5713_v18 = vld [vmem:[#allocation32_spill] sm:$0xff] }
 0x7da   :  { %v1886_v14 = vadd.f32 %v1885_v26, %v4628_v47  ;;  %v1887_v30 = vpop.f32.mrb[34].mxu1  ;;  %v5718_v26 = vld [vmem:[#allocation42_spill] sm:$0xff] }
 0x7db   :  { %v1892_v45 = vmax.f32 %v1884_v12, 0.0  ;;  %v1888_v58 = vpop.f32.mrb[35].mxu1  ;;  %v5714_v12 = vld [vmem:[#allocation34_spill] sm:$0xff] }
 0x7dc   :  { %v1893_v16 = vmax.f32 %v1886_v14, 0.0  ;;  %v3984_v58 = vld [vmem:[%s5404_s4 + $0x110] sm:$0xff]  }
 0x7dd   :  { %v1894_v35 = vmax.f32 %v1890_v4, %v1892_v45  ;;  %v5709_v45 = vld [vmem:[#allocation24_spill] sm:$0xff] }
 0x7de   :  { %v1895_v37 = vmax.f32 %v1891_v3, %v1893_v16  ;;  %v5710_v3 = vld [vmem:[#allocation26_spill] sm:$0xff]  ;;  %v5711_v4 = vld [vmem:[#allocation28_spill] sm:$0xff] }
 0x7df   :  { %v5719_v14 = vld [vmem:[#allocation44_spill] sm:$0xff] }
 0x7e0   :  { %1960 = vmatprep.mubr.f32.mxu0 %v1895_v37  ;;  %2030 = vmatprep.mubr.f32.mxu1 %v1895_v37 }
 0x7e1   :  { %1961 = vmatmul.mubr.f32.vlgmr.msra.gmra.mrb[36].mxu0 %v1894_v35  ;;  %2031 = vmatmul.mubr.f32.vlgmr.msra.gmra.mrb[36].mxu1 %v1894_v35 }
 0x7e2   :  { %3412 = vmatpush3.bf16.msra.mxu0 %v3982_v8  ;;  %2156 = vmatpush1.bf16.msra.mxu1 %v4853_v0  ;;  %v3985_v0 = vld [vmem:[%s5404_s4 + $0x118] sm:$0xff]  }
 0x7e3   :  { %3413 = vmatprep.subr.bf16.mxu0 %v5599_v33  ;;  %3427 = vmatprep.mubr.msk.bf16.mxu0 %vm4119_vm2, %v5599_v33 }
 0x7e4   :  { %2157 = vmatprep.subr.bf16.mxu1 %v4857_v2  ;;  %v3986_v2 = vld [vmem:[%s5404_s4 + $0x120] sm:$0xff]  }
 0x7e6   :  { %3414 = vmatpush3.bf16.msra.mxu0 %v3983_v38  ;;  %2158 = vmatpush1.bf16.msra.mxu1 %v4860_v51  ;;  %v3987_v51 = vld [vmem:[%s5404_s4 + $0x128] sm:$0xff]  }
 0x7e7   :  { %3415 = vmatprep.subr.bf16.mxu0 %v5599_v33  ;;  %2159 = vmatprep.subr.bf16.mxu1 %v4863_v60  ;;  %v3988_v60 = vld [vmem:[%s5404_s4 + $0x130] sm:$0xff]  }
 0x7ea   :  { %3416 = vmatpush3.bf16.msra.mxu0 %v3984_v58  ;;  %2160 = vmatpush1.bf16.msra.mxu1 %v4866_v1  ;;  %v5694_v1 = vld [vmem:[#allocation33_spill] sm:$0xff] }
 0x7eb   :  { %3417 = vmatprep.subr.bf16.mxu0 %v5599_v33  ;;  %2161 = vmatprep.subr.bf16.mxu1 %v4869_v41  ;;  %v5696_v41 = vld [vmem:[#allocation37_spill] sm:$0xff] }
 0x7ee   :  { %3418 = vmatpush3.bf16.msra.mxu0 %v3985_v0  ;;  %2162 = vmatpush1.bf16.msra.mxu1 %v4872_v19  ;;  %v5697_v19 = vld [vmem:[#allocation39_spill] sm:$0xff] }
 0x7ef   :  { %3419 = vmatprep.subr.bf16.mxu0 %v5599_v33  ;;  %2163 = vmatprep.subr.bf16.mxu1 %v4875_v21  ;;  %v5698_v21 = vld [vmem:[#allocation41_spill] sm:$0xff] }
 0x7f2   :  { %3420 = vmatpush3.bf16.msra.mxu0 %v3986_v2  ;;  %2164 = vmatpush1.bf16.msra.mxu1 %v4878_v25  ;;  %v5699_v25 = vld [vmem:[#allocation43_spill] sm:$0xff] }
 0x7f3   :  { %3421 = vmatprep.subr.bf16.mxu0 %v5599_v33  ;;  %2165 = vmatprep.subr.bf16.mxu1 %v4881_v27  ;;  %v5700_v27 = vld [vmem:[#allocation45_spill] sm:$0xff] }
 0x7f6   :  { %3422 = vmatpush3.bf16.msra.mxu0 %v3987_v51  ;;  %2166 = vmatpush1.bf16.msra.mxu1 %v4884_v32  ;;  %v5701_v32 = vld [vmem:[#allocation46_spill] sm:$0xff] }
 0x7f7   :  { %3423 = vmatprep.subr.bf16.mxu0 %v5599_v33  ;;  %2167 = vmatprep.subr.bf16.mxu1 %v4887_v34  ;;  %v5702_v34 = vld [vmem:[#allocation11_spill] sm:$0xff] }
 0x7fa   :  { %2168 = vmatpush1.bf16.msra.mxu1 %v4890_v43  ;;  %3424 = vmatpush3.bf16.msra.mxu0 %v3988_v60  ;;  %v5703_v43 = vld [vmem:[#allocation12_spill] sm:$0xff] }
 0x7fb   :  { %2169 = vmatprep.subr.bf16.mxu1 %v4893_v50  ;;  %3425 = vmatprep.subr.bf16.mxu0 %v5599_v33  ;;  %v5704_v50 = vld [vmem:[#allocation14_spill] sm:$0xff] }
 0x7fe   :  { %2170 = vmatpush1.bf16.msra.mxu1 %v4896_v23 }
 0x7ff   :  { %2171 = vmatprep.subr.bf16.mxu1 %v4899_v53  ;;  %v2145_v53 = vld [vmem:[#allocation2 + $0x28] sm:$0xff] }
 0x800   :  { %v2815_v23 = vcombine.low %v2145_v53, %v2145_v53 }
 0x802   :  { %2172 = vmatpush1.bf16.msra.mxu1 %v4902_v48  ;;  %v3989_v48 = vld [vmem:[%s5404_s4 + $0x138] sm:$0xff]  }
 0x803   :  { %2173 = vmatprep.subr.bf16.mxu1 %v4905_v39  ;;  %3426 = vmatpush3.bf16.msra.mxu0 %v3989_v48  ;;  %v5705_v39 = vld [vmem:[#allocation16_spill] sm:$0xff] }
 0x804   :  { %2196 = vmatprep.subr.bf16.mxu0 %v4781_v56  ;;  %v5692_v56 = vld [vmem:[#allocation29_spill] sm:$0xff] }
 0x806   :  { %2174 = vmatpush1.bf16.msra.mxu1 %v4908_v61  ;;  %v5706_v61 = vld [vmem:[#allocation18_spill] sm:$0xff] }
 0x807   :  { %2817 = vmatprep.subr.msk.bf16.mxu1 %vm410_vm1, %v4309_v44  ;;  %v2816_v44 = vcombine.high %v2145_v53, %v2145_v53 }
 0x809   :  { %2818 = vmatprep.mubr.msk.bf16.mxu1 %vm406_vm0, %v2816_v44 }
 0x80a   :  { %2176 = vmatpush1.bf16.msra.mxu1 %v4340_v54 }
 0x80b   :  { %3791 = vmatprep.subr.bf16.mxu1 %v5568_v5 }
 0x80d   :  { %2188 = vmatmul.mubr.bf16.vlgmr.msra.gmra.mrb[40].mxu1 %v2815_v23 }
 0x80e   :  { %3793 = vmatpush3.bf16.msra.mxu1 %v5570_v7 }
 0x80f   :  { %3795 = vmatprep.subr.bf16.mxu1 %v5572_v9 }
 0x812   :  { %3797 = vmatpush3.bf16.msra.mxu1 %v5574_v11 }
 0x813   :  { %3799 = vmatprep.subr.bf16.mxu1 %v5576_v13 }
 0x816   :  { %3801 = vmatpush3.bf16.msra.mxu1 %v5578_v15 }
 0x817   :  { %3803 = vmatprep.subr.bf16.mxu1 %v5580_v17 }
 0x81a   :  { %3805 = vmatpush3.bf16.msra.mxu1 %v5582_v20  ;;  %v5685_v20 = vld [vmem:[#allocation13_spill] sm:$0xff] }
 0x81b   :  { %3807 = vmatprep.subr.bf16.mxu1 %v5584_v24  ;;  %v5686_v24 = vld [vmem:[#allocation15_spill] sm:$0xff] }
 0x81e   :  { %3809 = vmatpush3.bf16.msra.mxu1 %v5586_v28  ;;  %v5687_v28 = vld [vmem:[#allocation17_spill] sm:$0xff] }
 0x81f   :  { %3811 = vmatprep.subr.bf16.mxu1 %v5607_v40  ;;  %v5707_v40 = vld [vmem:[#allocation20_spill] sm:$0xff] }
 0x822   :  { %3813 = vmatpush3.bf16.msra.mxu1 %v5608_v29  ;;  %v5708_v29 = vld [vmem:[#allocation22_spill] sm:$0xff] }
 0x823   :  { %3815 = vmatprep.subr.bf16.mxu1 %v5609_v57  ;;  %v5691_v57 = vld [vmem:[#allocation27_spill] sm:$0xff] }
 0x826   :  { %3817 = vmatpush3.bf16.msra.mxu1 %v5610_v42  ;;  %v5690_v42 = vld [vmem:[#allocation23_spill] sm:$0xff] }
 0x827   :  { %3819 = vmatprep.subr.bf16.mxu1 %v5611_v36  ;;  %v5689_v36 = vld [vmem:[#allocation21_spill] sm:$0xff] }
 0x82a   :  { %3821 = vmatpush3.bf16.msra.mxu1 %v5612_v31  ;;  %v5688_v31 = vld [vmem:[#allocation19_spill] sm:$0xff] }
 0x82b   :  { %3431 = vmatprep.subr.bf16.mxu1 %v5599_v33 }
 0x8b4   :  { %v3196_v54 = vpop.f32.mrb[36].mxu0  ;;  %v3231_v5 = vpop.f32.mrb[36].mxu1 }
 0x8b5   :  { %v3197_v7 = vpop.f32.mrb[37].mxu0  ;;  %v3232_v9 = vpop.f32.mrb[37].mxu1 }
 0x8b6   :  { %v3198_v11 = vadd.f32 %v3197_v7, %v3196_v54  ;;  %v3233_v13 = vadd.f32 %v3232_v9, %v3231_v5 }
 0x8b8   :  { %v2036_v15 = vmax.f32 %v3198_v11, %v3233_v13 }
 0x8ba   :  { %v2037_v17 = vpack.c.bf16 %v2036_v15, %v2036_v15 }
 0x8bc   :  { %3428 = vmatmul.mubr.bf16.vlgmr.msra.gmra.mrb[40].mxu0 %v2037_v17  ;;  %v3996_v17 = vld [vmem:[%s5404_s4 + $0x160] sm:$0xff]  }
 0x8bd   :  { %2197 = vmatpush1.bf16.msra.mxu0 %v4784_v59  ;;  %2820 = vmatprep.mubr.msk.bf16.mxu0 %vm406_vm0, %v2816_v44  ;;  %v5693_v59 = vld [vmem:[#allocation31_spill] sm:$0xff] }
 0x8be   :  { %2198 = vmatprep.subr.bf16.mxu0 %v4787_v62  ;;  %v5695_v62 = vld [vmem:[#allocation35_spill] sm:$0xff] }
 0x8c1   :  { %2199 = vmatpush1.bf16.msra.mxu0 %v5685_v20  ;;  %v3997_v20 = vld [vmem:[%s5404_s4 + $0x168] sm:$0xff]  }
 0x8c2   :  { %2200 = vmatprep.subr.bf16.mxu0 %v5686_v24  ;;  %v3998_v24 = vld [vmem:[%s5404_s4 + $0x170] sm:$0xff]  }
 0x8c5   :  { %2201 = vmatpush1.bf16.msra.mxu0 %v5687_v28  ;;  %v3999_v28 = vld [vmem:[%s5404_s4 + $0x178] sm:$0xff]  }
 0x8c6   :  { %2202 = vmatprep.subr.bf16.mxu0 %v5688_v31  ;;  %v2499_v31 = vld [vmem:[%s5406_s6] sm:$0xff] }
 0x8c9   :  { %2203 = vmatpush1.bf16.msra.mxu0 %v5689_v36  ;;  %v2500_v36 = vld [vmem:[%s5406_s6 + $0x8] sm:$0xff] }
 0x8ca   :  { %2204 = vmatprep.subr.bf16.mxu0 %v5690_v42  ;;  %v2501_v42 = vld [vmem:[%s5406_s6 + $0x10] sm:$0xff] }
 0x8cd   :  { %2205 = vmatpush1.bf16.msra.mxu0 %v5691_v57  ;;  %v4120_v57 = vmov 0.0|0.0  }
 0x8ce   :  { %2206 = vmatprep.subr.bf16.mxu0 %v5692_v56  ;;  %v2502_v56 = vld [vmem:[%s5406_s6 + $0x18] sm:$0xff] }
 0x8d1   :  { %2207 = vmatpush1.bf16.msra.mxu0 %v5693_v59  ;;  %v3858_v59 = vpack.c.bf16 %v2502_v56, %v2501_v42 }
 0x8d2   :  { %2208 = vmatprep.subr.bf16.mxu0 %v5694_v1 }
 0x8d5   :  { %2209 = vmatpush1.bf16.msra.mxu0 %v5695_v62 }
 0x8d6   :  { %2210 = vmatprep.subr.bf16.mxu0 %v5696_v41 }
 0x8d9   :  { %2211 = vmatpush1.bf16.msra.mxu0 %v5697_v19 }
 0x8da   :  { %2212 = vmatprep.subr.bf16.mxu0 %v5698_v21 }
 0x8dd   :  { %2213 = vmatpush1.bf16.msra.mxu0 %v5699_v25 }
 0x8de   :  { %2214 = vmatprep.subr.bf16.mxu0 %v5700_v27 }
 0x8e0   :  { %v2189_v30 = vpop.f32.mrb[40].mxu1 }
 0x8e1   :  { %2215 = vmatpush1.bf16.msra.mxu0 %v5701_v32  ;;  %v2191_v16 = vpop.f32.mrb[41].mxu1  ;;  %v2190_v51 = vadd.f32 %v2189_v30, %v4622_v55  ;;  %v3992_v55 = vld [vmem:[%s5404_s4 + $0x140] sm:$0xff]  }
 0x8e2   :  { %2819 = vmatprep.subr.msk.bf16.mxu0 %vm410_vm1, %v5702_v34  ;;  %v2193_v35 = vpop.f32.mrb[42].mxu1  ;;  %v2192_v60 = vadd.f32 %v2191_v16, %v4626_v63  ;;  %v3993_v63 = vld [vmem:[%s5404_s4 + $0x148] sm:$0xff]   ;;  %v2503_v34 = vld [vmem:[%s5406_s6 + $0x20] sm:$0xff] }
 0x8e3   :  { %v2194_v37 = vpop.f32.mrb[43].mxu1  ;;  %v2237_v53 = vmax.f32 %v2190_v51, 0.0 }
 0x8e4   :  { %v2238_v54 = vmax.f32 %v2192_v60, 0.0 }
 0x8e5   :  { %2217 = vmatpush1.bf16.msra.mxu0 %v5703_v43  ;;  %v2504_v43 = vld [vmem:[%s5406_s6 + $0x28] sm:$0xff] }
 0x8e6   :  { %3823 = vmatprep.subr.bf16.mxu0 %v5704_v50  ;;  %v3861_v50 = vpack.c.bf16 %v2504_v43, %v2503_v34 }
 0x8e8   :  { %2229 = vmatmul.mubr.bf16.vlgmr.msra.gmra.mrb[44].mxu0 %v2815_v23 }
 0x8e9   :  { %3825 = vmatpush3.bf16.msra.mxu0 %v5705_v39  ;;  %v2505_v39 = vld [vmem:[%s5406_s6 + $0x30] sm:$0xff] }
 0x8ea   :  { %3827 = vmatprep.subr.bf16.mxu0 %v5706_v61  ;;  %v2506_v61 = vld [vmem:[%s5406_s6 + $0x38] sm:$0xff]  ;;  %s4121_s6 = smov [#allocation7]  }
 0x8eb   :  { %s2595_s29 = sshll.u32 %s4121_s6, 4  ;;  %s2596_s29 = int_to_ptr.vmem [resolvable:$true] %s2595_s29 }
 0x8ec   :  { %p4089_p3 = scmp.lt.s32.totalorder %s2596_s29, %s2596_s29 }
 0x8ed   :  { %3829 = vmatpush3.bf16.msra.mxu0 %v5707_v40  ;;  %v3864_v40 = vpack.c.bf16 %v2506_v61, %v2505_v39 }
 0x8ee   :  { %3831 = vmatprep.subr.bf16.mxu0 %v5708_v29  ;;  %v2845_v29 = vld [vmem:[%s5405_s5] ss:$0 sm:$0xff]  ;;  %s4084_s5 = scalar_lea.vmem %s2596_s29, 128 }
 0x8ef   :  { %p4085_p2 = scmp.ne.s32.totalorder %s2596_s29, %s4084_s5  ;;  %p4090_p4 = scmp.lt.s32.totalorder %s4084_s5, %s4084_s5 }
 0x8f1   :  { %3833 = vmatpush3.bf16.msra.mxu0 %v5709_v45  ;;  %p4091_p5 = por %p4090_p4, %p4089_p3 }
 0x8f2   :  { %3835 = vmatprep.subr.bf16.mxu0 %v5710_v3 }
 0x8f3   :  { %p4092_p6 = pnand %p4091_p5, %p4085_p2 }
 0x8f5   :  { %3837 = vmatpush3.bf16.msra.mxu0 %v5711_v4 }
 0x8f6   :  { %3839 = vmatprep.subr.bf16.mxu0 %v5712_v49 }
 0x8f9   :  { %3841 = vmatpush3.bf16.msra.mxu0 %v5713_v18 }
 0x8fa   :  { %3843 = vmatprep.subr.bf16.mxu0 %v5714_v12 }
 0x8fd   :  { %3845 = vmatpush3.bf16.msra.mxu0 %v5715_v52 }
 0x8fe   :  { %3847 = vmatprep.subr.bf16.mxu0 %v5716_v22  ;;  %v2846_v22 = vld [vmem:[%s5407_s7] ss:$0 sm:$0xff] }
 0x901   :  { %3849 = vmatpush3.bf16.msra.mxu0 %v5717_v10 }
 0x902   :  { %3851 = vmatprep.subr.bf16.mxu0 %v5718_v26 }
 0x905   :  { %3853 = vmatpush3.bf16.msra.mxu0 %v5719_v14 }
 0x906   :  { %3854 = vmatprep.subr.bf16.mxu0 %v4120_v57 }
 0x98f   :  { %v2137_v8 = vpop.f32.mrb[40].mxu0 }
 0x990   :  { %v5316_v38 = vadd.f32 %v2137_v8, %v5196_v6  ;;  %v3429_v58 = vpop.f32.mrb[41].mxu0 }
 0x991   :  { %v2140_v0 = vpop.f32.mrb[42].mxu0 }
 0x992   :  { %v3430_v2 = vpop.f32.mrb[43].mxu0 }
 0x9bb   :  { %v2230_v48 = vpop.f32.mrb[44].mxu0 }
 0x9bc   :  { %v2231_v44 = vadd.f32 %v2230_v48, %v4624_v46  ;;  %v2232_v23 = vpop.f32.mrb[45].mxu0  ;;  %v3995_v46 = vld [vmem:[%s5404_s4 + $0x158] sm:$0xff]  }
 0x9bd   :  { %v2233_v5 = vadd.f32 %v2232_v23, %v4628_v47  ;;  %v2234_v7 = vpop.f32.mrb[46].mxu0  ;;  %v3994_v47 = vld [vmem:[%s5404_s4 + $0x150] sm:$0xff]  }
 0x9be   :  { %v2239_v9 = vmax.f32 %v2231_v44, 0.0  ;;  %v2235_v11 = vpop.f32.mrb[47].mxu0 }
 0x9bf   :  { %v2240_v6 = vmax.f32 %v2233_v5, 0.0 }
 0x9c0   :  { %v2241_v13 = vmax.f32 %v2237_v53, %v2239_v9 }
 0x9c1   :  { %v2242_v15 = vmax.f32 %v2238_v54, %v2240_v6 }
 0x9c3   :  { %2307 = vmatprep.mubr.f32.mxu1 %v2242_v15  ;;  %2377 = vmatprep.mubr.f32.mxu0 %v2242_v15 }
 0x9c4   :  { %2308 = vmatmul.mubr.f32.vlgmr.msra.gmra.mrb[38].mxu1 %v2241_v13  ;;  %2378 = vmatmul.mubr.f32.vlgmr.msra.gmra.mrb[38].mxu0 %v2241_v13 }
 0x9c5   :  { %3432 = vmatpush3.bf16.msra.mxu1 %v3992_v55  ;;  %3447 = vmatprep.mubr.msk.bf16.mxu1 %vm4119_vm2, %v5599_v33 }
 0x9c6   :  { %3433 = vmatprep.subr.bf16.mxu1 %v5599_v33  ;;  %3467 = vmatprep.mubr.msk.f32.mxu0 %vm4119_vm2, %v5599_v33 }
 0x9c9   :  { %3434 = vmatpush3.bf16.msra.mxu1 %v3993_v63 }
 0x9ca   :  { %3435 = vmatprep.subr.bf16.mxu1 %v5599_v33 }
 0x9cd   :  { %3436 = vmatpush3.bf16.msra.mxu1 %v3994_v47 }
 0x9ce   :  { %3437 = vmatprep.subr.bf16.mxu1 %v5599_v33 }
 0x9d1   :  { %3438 = vmatpush3.bf16.msra.mxu1 %v3995_v46 }
 0x9d2   :  { %3439 = vmatprep.subr.bf16.mxu1 %v5599_v33 }
 0x9d5   :  { %3440 = vmatpush3.bf16.msra.mxu1 %v3996_v17 }
 0x9d6   :  { %3441 = vmatprep.subr.bf16.mxu1 %v5599_v33 }
 0x9d9   :  { %3442 = vmatpush3.bf16.msra.mxu1 %v3997_v20 }
 0x9da   :  { %3443 = vmatprep.subr.bf16.mxu1 %v5599_v33 }
 0x9dd   :  { %3444 = vmatpush3.bf16.msra.mxu1 %v3998_v24 }
 0x9de   :  { %3445 = vmatprep.subr.bf16.mxu1 %v5599_v33  ;;  %v3855_v33 = vpack.c.bf16 %v2500_v36, %v2499_v31 }
 0x9e0   :  { %3856 = vmatpush3.bf16.msra.mxu0 %v3855_v33 }
 0x9e1   :  { %3446 = vmatpush3.bf16.msra.mxu1 %v3999_v28  ;;  %3857 = vmatprep.subr.bf16.mxu0 %v4120_v57 }
 0x9e4   :  { %3859 = vmatpush3.bf16.msra.mxu0 %v3858_v59 }
 0x9e5   :  { %3860 = vmatprep.subr.bf16.mxu0 %v4120_v57 }
 0x9e8   :  { %3862 = vmatpush3.bf16.msra.mxu0 %v3861_v50 }
 0x9e9   :  { %3863 = vmatprep.subr.bf16.mxu0 %v4120_v57 }
 0x9ec   :  { %3865 = vmatpush3.bf16.msra.mxu0 %v3864_v40 }
 0xa97   :  { %v3275_v1 = vpop.f32.mrb[38].mxu1  ;;  %v3310_v62 = vpop.f32.mrb[38].mxu0 }
 0xa98   :  { %v3276_v41 = vpop.f32.mrb[39].mxu1  ;;  %v3311_v19 = vpop.f32.mrb[39].mxu0 }
 0xa99   :  { %v3277_v21 = vadd.f32 %v3276_v41, %v3275_v1  ;;  %v3312_v25 = vadd.f32 %v3311_v19, %v3310_v62 }
 0xa9b   :  { %v2383_v27 = vmax.f32 %v3277_v21, %v3312_v25 }
 0xa9d   :  { %v2384_v32 = vpack.c.bf16 %v2383_v27, %v2383_v27 }
 0xa9f   :  { %3448 = vmatmul.mubr.bf16.vlgmr.msra.gmra.mrb[44].mxu1 %v2384_v32 }
 0xb72   :  { %v2484_v45 = vpop.f32.mrb[44].mxu1 }
 0xb73   :  { %v2490_v3 = vadd.f32 %v2484_v45, %v5316_v38  ;;  %v3449_v4 = vpop.f32.mrb[45].mxu1 }
 0xb74   :  { %v2487_v49 = vpop.f32.mrb[46].mxu1 }
 0xb75   :  { %v2497_v18 = vadd.f32 %v2845_v29, %v2490_v3  ;;  %v3450_v12 = vpop.f32.mrb[47].mxu1 }
 0xb77   :  { %v2498_v52 = vmax.f32 %v2497_v18, 0.0 }
 0xb79   :  { %3468 = vmatmul.mubr.msk.f32.vlgmr.msra.gmra.mrb[48].mxu0 %vm2514_vm3, %v2498_v52 }
 0xc4c   :  { %v2584_v10 = vpop.f32.mrb[48].mxu0 }
 0xc4d   :  { %v2585_v26 = vadd.f32 %v2846_v22, %v2584_v10  ;;  %v3469_v14 = vpop.f32.mrb[49].mxu0 }
 0xc4f   :  { %2588 = vst [vmem:[#allocation7] sm:$0xff] %v2585_v26 }
 0xc50   :  { %4095 = shalt.err (!%p4092_p6)
}
 0xc51   :  { %s4096_s30 = scalar_lea.hbm %s5408_s8, 128 }
 0xc52   :  { %p4097_p7 = scmp.ne.s32.totalorder %s5408_s8, %s4096_s30  ;;  %p4100_p8 = scmp.lt.u32.totalorder %s4096_s30, %s5408_s8 }
 0xc54   :  { %p4102_p9 = pnand %p4100_p8, %p4097_p7 }
 0xc56   :  { %4105 = shalt.err (!%p4102_p9)
}
 0xc57   :  { %2598 = dma.vmem_to_hbm [thread:$0]  %s2596_s29, 128, %s5408_s8, [#allocation4]  }
 0xc58   :  { %4110 = dma.done.wait [#allocation4], 128  }
 0xc59   :  { %4111 = vsyncadd [#allocation4], 4294967168 }
 0xc5a   :  { %2602 = vsyncpa [#allocation3], 1 }
 0xc5b   :  { %2603 = vsyncpa [#allocation6], 1 }
 0xc5c   :  { %2604 = vsyncpa [#allocation4], 1 }

</bundles_post_ra>
